<compile_context>
chip_gen: v7x
topology: tpu7x:2x2x1
jax: 0.10.0
libtpu: 0.0.40
codegen_flags: <defaults>
</compile_context>

<pallas_src>
import functools

import jax
import jax.numpy as jnp
from jax import lax
from jax.experimental import pallas as pl
from jax.experimental.pallas import tpu as pltpu


def de_global_posetrack_kernel(seq_ref, wih_f_ref, whh_f_ref, b_f_ref,
                               wih_d_ref, whh_d_ref, b_d_ref,
                               wfc_ref, bfc_ref, out_ref, inp_ref,
                               *, seq_len, batch, hidden_size, pred_len,
                               hardtanh_limit):
    T, B, H = seq_len, batch, hidden_size
    H2 = 2 * H          # fused encoder hidden width: [h_pose | h_vel]
    GF = 8 * H          # fused encoder gate width (4 gates x 2H)
    GD = 4 * H          # decoder gate width

    # ---- (1) prologue: input projection for BOTH encoders over ALL timesteps.
    # K=4 is pathological for the MXU, so use 4 VPU broadcast-FMAs, fold in the
    # bias, and park the result in a VMEM scratch (keeps ~16 vregs from staying
    # live across the unrolled recurrence).
    seq = seq_ref[...]                                    # (T*B, 4) time-major
    wih_f = wih_f_ref[...]                                # (4, 8H)
    acc = jnp.broadcast_to(b_f_ref[...], (T * B, GF))
    for k in range(4):
        acc = acc + seq[:, k:k + 1] * wih_f[k:k + 1, :]
    inp_ref[...] = acc                                    # (T*B, 8H)

    # ---- (2) fused encoder recurrence (single LSTM of width 2H).
    # One tanh pass per step; precomputed lane masks turn non-g lanes into
    # sigmoid via  sigmoid(x) = 0.5*tanh(0.5*x) + 0.5.
    lane_f = lax.broadcasted_iota(jnp.int32, (B, GF), 1)
    is_g_f = (lane_f >= 2 * H2) & (lane_f < 3 * H2)       # tanh (g) gate block
    scale_f = jnp.where(is_g_f, 1.0, 0.5).astype(jnp.float32)
    shift_f = jnp.where(is_g_f, 0.0, 0.5).astype(jnp.float32)

    h = jnp.zeros((B, H2), jnp.float32)
    c = jnp.zeros((B, H2), jnp.float32)
    for t in range(T):                                    # fully unrolled, static slices
        gates = (jnp.dot(h, whh_f_ref[...],
                         preferred_element_type=jnp.float32)
                 + inp_ref[t * B:(t + 1) * B, :])
        act = jnp.tanh(gates * scale_f) * scale_f + shift_f
        i_g = act[:, 0 * H2:1 * H2]
        f_g = act[:, 1 * H2:2 * H2]
        g_g = act[:, 2 * H2:3 * H2]
        o_g = act[:, 3 * H2:4 * H2]
        c = f_g * c + i_g * g_g
        h = o_g * jnp.tanh(c)

    # ---- (3) combine encoder states: hidden/cell = pose + vel ----
    h_dec = h[:, :H] + h[:, H:]
    c_dec = c[:, :H] + c[:, H:]

    # ---- (4) autoregressive decoder: LSTMCell + Linear + Hardtanh ----
    # TODO(synk): hold whh_f / whh_d resident in the MXU with
    # pltpu.matmul_push_rhs / matmul_acc_lhs / matmul_pop once per loop; kept as
    # jnp.dot here for portable lowering across v5e/v6e/v7x.
    wih_d = wih_d_ref[...]                                # (2, 4H)
    # hoist all broadcasts out of the loop (JAX does not CSE broadcast_in_dim)
    wih_d0 = jnp.broadcast_to(wih_d[0:1, :], (B, GD))
    wih_d1 = jnp.broadcast_to(wih_d[1:2, :], (B, GD))
    b_d = jnp.broadcast_to(b_d_ref[...], (B, GD))
    b_fc = jnp.broadcast_to(bfc_ref[...], (B, 2))
    lane_d = lax.broadcasted_iota(jnp.int32, (B, GD), 1)
    is_g_d = (lane_d >= 2 * H) & (lane_d < 3 * H)
    scale_d = jnp.where(is_g_d, 1.0, 0.5).astype(jnp.float32)
    shift_d = jnp.where(is_g_d, 0.0, 0.5).astype(jnp.float32)

    h, c = h_dec, c_dec
    x = seq_ref[(T - 1) * B:T * B, 2:4]                   # VelDec_inp = vel[:, -1, :]
    for step in range(pred_len):                          # static unroll (pred_len small)
        # K=2 input projection on the VPU: no second MXU round trip on the chain
        gates = (x[:, 0:1] * wih_d0 + x[:, 1:2] * wih_d1
                 + jnp.dot(h, whh_d_ref[...],
                           preferred_element_type=jnp.float32)
                 + b_d)
        act = jnp.tanh(gates * scale_d) * scale_d + shift_d
        i_g = act[:, 0 * H:1 * H]
        f_g = act[:, 1 * H:2 * H]
        g_g = act[:, 2 * H:3 * H]
        o_g = act[:, 3 * H:4 * H]
        c = f_g * c + i_g * g_g
        h = o_g * jnp.tanh(c)
        y = jnp.dot(h, wfc_ref[...], preferred_element_type=jnp.float32) + b_fc
        y = jnp.clip(y, -hardtanh_limit, hardtanh_limit)  # nn.Hardtanh
        out_ref[:, 2 * step:2 * step + 2] = y             # dropout = identity (eval)
        x = y


def _fuse_encoder_params(params, H):
    """Build block-diagonal fused-encoder weights.

    Fused hidden layout: [h_pose | h_vel] (width 2H).
    Fused gate layout: for each gate k in (i, f, g, o): [gate_k_pose | gate_k_vel],
    so the fused recurrence is exactly a single LSTM of hidden size 2H.
    """
    def gsplit(w):
        return [w[:, k * H:(k + 1) * H] for k in range(4)]

    wih_p, whh_p, b_p = params['wih_p'], params['whh_p'], params['b_p']
    wih_v, whh_v, b_v = params['wih_v'], params['whh_v'], params['b_v']
    zi = jnp.zeros_like(wih_p[:, :H])       # (in, H)
    zh = jnp.zeros_like(whh_p[:, :H])       # (H, H)

    wih_cols, whh_cols, b_cols = [], [], []
    for wp, wv in zip(gsplit(wih_p), gsplit(wih_v)):
        wih_cols += [jnp.concatenate([wp, zi], axis=0),
                     jnp.concatenate([zi, wv], axis=0)]
    for wp, wv in zip(gsplit(whh_p), gsplit(whh_v)):
        whh_cols += [jnp.concatenate([wp, zh], axis=0),
                     jnp.concatenate([zh, wv], axis=0)]
    for bp, bv in zip(gsplit(b_p), gsplit(b_v)):
        b_cols += [bp, bv]

    return (jnp.concatenate(wih_cols, axis=1),    # (2*in, 8H)
            jnp.concatenate(whh_cols, axis=1),    # (2H, 8H)
            jnp.concatenate(b_cols, axis=1))      # (1, 8H)


def de_global_posetrack(pose, vel, params, *, hidden_size, pred_len,
                        hardtanh_limit):
    """pose, vel: (B, T, 2) float32.  Returns (B, pred_len, 2)."""
    B, T, F = pose.shape
    H = hidden_size

    # Wrapper-side data prep (plain XLA): time-major, feature-concat, flattened.
    seq = jnp.concatenate([jnp.transpose(pose, (1, 0, 2)),    # pose.permute(1,0,2)
                           jnp.transpose(vel, (1, 0, 2))], axis=-1)
    seq_flat = seq.reshape(T * B, 2 * F)                      # (T*B, 4)

    wih_f, whh_f, b_f = _fuse_encoder_params(params, H)

    kernel = functools.partial(de_global_posetrack_kernel,
                               seq_len=T, batch=B, hidden_size=H,
                               pred_len=pred_len,
                               hardtanh_limit=hardtanh_limit)

    args = (seq_flat, wih_f, whh_f, b_f,
            params['wih_d'], params['whh_d'], params['b_d'],
            params['wfc'], params['bfc'])

    # Advisory cost hint so XLA schedules around this tiny latency-bound call.
    flops = (2 * T * B * 4 * 8 * H                 # encoder input projection
             + 2 * T * B * (2 * H) * (8 * H)       # fused encoder recurrence
             + 2 * pred_len * B * 2 * (4 * H)      # decoder input projection
             + 2 * pred_len * B * H * (4 * H)      # decoder recurrence
             + 2 * pred_len * B * H * 2)           # fc head
    transcendentals = T * B * (8 * H + 2 * H) + pred_len * B * (4 * H + H)
    bytes_accessed = sum(int(a.size) * 4 for a in args) + B * 2 * pred_len * 4
    cost = pl.CostEstimate(flops=int(flops),
                           transcendentals=int(transcendentals),
                           bytes_accessed=int(bytes_accessed))

    out_flat = pl.pallas_call(
        kernel,
        out_shape=jax.ShapeDtypeStruct((B, 2 * pred_len), jnp.float32),
        in_specs=[pl.BlockSpec(memory_space=pltpu.MemorySpace.VMEM)
                  for _ in args],
        out_specs=pl.BlockSpec(memory_space=pltpu.MemorySpace.VMEM),
        scratch_shapes=[pltpu.VMEM((T * B, 8 * H), jnp.float32)],
        cost_estimate=cost,
    )(*args)

    return out_flat.reshape(B, pred_len, F)


def init_params(key, hidden_size, input_size=2, out_features=2):
    """Deterministic PyTorch-style uniform(-1/sqrt(H), 1/sqrt(H)) init."""
    H = hidden_size
    bound = 1.0 / float(H) ** 0.5
    keys = jax.random.split(key, 14)

    def u(k, shape):
        return jax.random.uniform(k, shape, jnp.float32, -bound, bound)

    params = {}
    idx = 0
    for name in ('p', 'v', 'd'):                 # pose enc, vel enc, decoder
        wih = u(keys[idx], (4 * H, input_size)); idx += 1
        whh = u(keys[idx], (4 * H, H)); idx += 1
        bih = u(keys[idx], (4 * H,)); idx += 1
        bhh = u(keys[idx], (4 * H,)); idx += 1
        params['wih_' + name] = wih.T                 # (input, 4H)
        params['whh_' + name] = whh.T                 # (H, 4H)
        params['b_' + name] = (bih + bhh)[None, :]    # (1, 4H)
    wfc = u(keys[idx], (out_features, H)); idx += 1
    bfc = u(keys[idx], (out_features,)); idx += 1
    params['wfc'] = wfc.T                             # (H, out)
    params['bfc'] = bfc[None, :]                      # (1, out)
    return params


def reference(pose, vel, params, *, hidden_size, pred_len, hardtanh_limit):
    """Pure-JAX reference of the same forward pass (for correctness check)."""
    H = hidden_size

    def step(x, h, c, wih, whh, b):
        g_ = x @ wih + h @ whh + b
        i = jax.nn.sigmoid(g_[:, :H])
        f = jax.nn.sigmoid(g_[:, H:2 * H])
        g = jnp.tanh(g_[:, 2 * H:3 * H])
        o = jax.nn.sigmoid(g_[:, 3 * H:4 * H])
        c = f * c + i * g
        return o * jnp.tanh(c), c

    def enc(seq, wih, whh, b):
        B = seq.shape[1]
        h = jnp.zeros((B, H), jnp.float32)
        c = jnp.zeros((B, H), jnp.float32)
        for t in range(seq.shape[0]):
            h, c = step(seq[t], h, c, wih, whh, b)
        return h, c

    pose_tb = jnp.transpose(pose, (1, 0, 2))
    vel_tb = jnp.transpose(vel, (1, 0, 2))
    hv, cv = enc(vel_tb, params['wih_v'], params['whh_v'], params['b_v'])
    hp, cp = enc(pose_tb, params['wih_p'], params['whh_p'], params['b_p'])
    h, c = hp + hv, cp + cv
    x = vel[:, -1, :]
    outs = []
    for _ in range(pred_len):
        h, c = step(x, h, c, params['wih_d'], params['whh_d'], params['b_d'])
        y = jnp.clip(h @ params['wfc'] + params['bfc'],
                     -hardtanh_limit, hardtanh_limit)
        outs.append(y)
        x = y
    return jnp.stack(outs, axis=1)


if __name__ == "__main__":
    B, T, H, PRED = 8, 8, 32, 4          # batch, obs_len, hidden_size, pred_len
    LIMIT = 1.0                           # args.hardtanh_limit

    key = jax.random.PRNGKey(0)
    kp, kv, kw = jax.random.split(key, 3)
    pose = jax.random.normal(kp, (B, T, 2), jnp.float32)
    vel = jax.random.normal(kv, (B, T, 2), jnp.float32)
    params = init_params(kw, H)

    fwd = jax.jit(functools.partial(de_global_posetrack, hidden_size=H,
                                    pred_len=PRED, hardtanh_limit=LIMIT))
    out = jax.block_until_ready(fwd(pose, vel, params))

    ref = reference(pose, vel, params, hidden_size=H,
                    pred_len=PRED, hardtanh_limit=LIMIT)
    assert out.shape == (B, PRED, 2), out.shape
    err = float(jnp.max(jnp.abs(out - ref)))
    assert err < 1e-4, err
    print("KERNEL_OK")
</pallas_src>

<mosaic_0001>
module attributes {stable_mosaic.version = 11 : i64} {
  func.func @de_global_posetrack_kernel(%arg0: memref<64x4xf32, #tpu.memory_space<vmem>>, %arg1: memref<4x256xf32, #tpu.memory_space<vmem>>, %arg2: memref<64x256xf32, #tpu.memory_space<vmem>>, %arg3: memref<1x256xf32, #tpu.memory_space<vmem>>, %arg4: memref<2x128xf32, #tpu.memory_space<vmem>>, %arg5: memref<32x128xf32, #tpu.memory_space<vmem>>, %arg6: memref<1x128xf32, #tpu.memory_space<vmem>>, %arg7: memref<32x2xf32, #tpu.memory_space<vmem>>, %arg8: memref<1x2xf32, #tpu.memory_space<vmem>>, %arg9: memref<8x8xf32, #tpu.memory_space<vmem>>, %arg10: memref<64x256xf32, #tpu.memory_space<vmem>>) attributes {dimension_semantics = [], scalar_prefetch = 0 : i64, scratch_operands = 1 : i64, tpu.core_type = #tpu.core_type<tc>} {
    %c0 = arith.constant 0 : index
    %c0_0 = arith.constant 0 : index
    %0 = vector.load %arg0[%c0, %c0_0] : memref<64x4xf32, #tpu.memory_space<vmem>>, vector<64x4xf32>
    %c0_1 = arith.constant 0 : index
    %c0_2 = arith.constant 0 : index
    %1 = vector.load %arg1[%c0_1, %c0_2] : memref<4x256xf32, #tpu.memory_space<vmem>>, vector<4x256xf32>
    %c0_3 = arith.constant 0 : index
    %c0_4 = arith.constant 0 : index
    %2 = vector.load %arg3[%c0_3, %c0_4] : memref<1x256xf32, #tpu.memory_space<vmem>>, vector<1x256xf32>
    %3 = vector.shape_cast %2 : vector<1x256xf32> to vector<1x256xf32>
    %4 = vector.broadcast %3 : vector<1x256xf32> to vector<64x256xf32>
    %5 = vector.extract_strided_slice %0 {offsets = [0, 0], sizes = [64, 1], strides = [1, 1]} : vector<64x4xf32> to vector<64x1xf32>
    %6 = vector.extract_strided_slice %1 {offsets = [0, 0], sizes = [1, 256], strides = [1, 1]} : vector<4x256xf32> to vector<1x256xf32>
    %7 = vector.broadcast %5 : vector<64x1xf32> to vector<64x256xf32>
    %8 = vector.broadcast %6 : vector<1x256xf32> to vector<64x256xf32>
    %9 = arith.mulf %7, %8 : vector<64x256xf32>
    %10 = arith.addf %4, %9 : vector<64x256xf32>
    %11 = vector.extract_strided_slice %0 {offsets = [0, 1], sizes = [64, 1], strides = [1, 1]} : vector<64x4xf32> to vector<64x1xf32>
    %12 = vector.extract_strided_slice %1 {offsets = [1, 0], sizes = [1, 256], strides = [1, 1]} : vector<4x256xf32> to vector<1x256xf32>
    %13 = vector.broadcast %11 : vector<64x1xf32> to vector<64x256xf32>
    %14 = vector.broadcast %12 : vector<1x256xf32> to vector<64x256xf32>
    %15 = arith.mulf %13, %14 : vector<64x256xf32>
    %16 = arith.addf %10, %15 : vector<64x256xf32>
    %17 = vector.extract_strided_slice %0 {offsets = [0, 2], sizes = [64, 1], strides = [1, 1]} : vector<64x4xf32> to vector<64x1xf32>
    %18 = vector.extract_strided_slice %1 {offsets = [2, 0], sizes = [1, 256], strides = [1, 1]} : vector<4x256xf32> to vector<1x256xf32>
    %19 = vector.broadcast %17 : vector<64x1xf32> to vector<64x256xf32>
    %20 = vector.broadcast %18 : vector<1x256xf32> to vector<64x256xf32>
    %21 = arith.mulf %19, %20 : vector<64x256xf32>
    %22 = arith.addf %16, %21 : vector<64x256xf32>
    %23 = vector.extract_strided_slice %0 {offsets = [0, 3], sizes = [64, 1], strides = [1, 1]} : vector<64x4xf32> to vector<64x1xf32>
    %24 = vector.extract_strided_slice %1 {offsets = [3, 0], sizes = [1, 256], strides = [1, 1]} : vector<4x256xf32> to vector<1x256xf32>
    %25 = vector.broadcast %23 : vector<64x1xf32> to vector<64x256xf32>
    %26 = vector.broadcast %24 : vector<1x256xf32> to vector<64x256xf32>
    %27 = arith.mulf %25, %26 : vector<64x256xf32>
    %28 = arith.addf %22, %27 : vector<64x256xf32>
    %c0_5 = arith.constant 0 : index
    %c0_6 = arith.constant 0 : index
    %29 = vector.load %arg10[%c0_5, %c0_6] : memref<64x256xf32, #tpu.memory_space<vmem>>, vector<64x256xf32>
    tpu.vector_store %arg10[%c0_5, %c0_6], %28 {strides = array<i32>} : memref<64x256xf32, #tpu.memory_space<vmem>>, vector<64x256xf32>,
    %30 = tpu.iota {dimensions = array<i32: 1>} : vector<8x256xi32>
    %c128_i32 = arith.constant 128 : i32
    %31 = vector.broadcast %c128_i32 : i32 to vector<8x256xi32>
    %32 = arith.cmpi sge, %30, %31 : vector<8x256xi32>
    %c192_i32 = arith.constant 192 : i32
    %33 = vector.broadcast %c192_i32 : i32 to vector<8x256xi32>
    %34 = arith.cmpi slt, %30, %33 : vector<8x256xi32>
    %35 = arith.andi %32, %34 : vector<8x256xi1>
    %cst = arith.constant 1.000000e+00 : f32
    %cst_7 = arith.constant 5.000000e-01 : f32
    %36 = vector.broadcast %cst : f32 to vector<8x256xf32>
    %37 = vector.broadcast %cst_7 : f32 to vector<8x256xf32>
    %38 = arith.select %35, %36, %37 : vector<8x256xi1>, vector<8x256xf32>
    %cst_8 = arith.constant 0.000000e+00 : f32
    %cst_9 = arith.constant 5.000000e-01 : f32
    %39 = vector.broadcast %cst_8 : f32 to vector<8x256xf32>
    %40 = vector.broadcast %cst_9 : f32 to vector<8x256xf32>
    %41 = arith.select %35, %39, %40 : vector<8x256xi1>, vector<8x256xf32>
    %cst_10 = arith.constant 0.000000e+00 : f32
    %42 = vector.broadcast %cst_10 : f32 to vector<8x64xf32>
    %cst_11 = arith.constant 0.000000e+00 : f32
    %43 = vector.broadcast %cst_11 : f32 to vector<8x64xf32>
    %c0_12 = arith.constant 0 : index
    %c0_13 = arith.constant 0 : index
    %44 = vector.load %arg2[%c0_12, %c0_13] : memref<64x256xf32, #tpu.memory_space<vmem>>, vector<64x256xf32>
    %cst_14 = arith.constant dense<0.000000e+00> : vector<8x256xf32>
    %45 = tpu.matmul %42, %44, %cst_14 {dimension_numbers = #tpu.dot_dimension_numbers<[1], [0], [0], [1], [0, 0, 1, 1], [], []>} : vector<8x64xf32>, vector<64x256xf32>, vector<8x256xf32> -> vector<8x256xf32>
    %c0_15 = arith.constant 0 : index
    %c0_16 = arith.constant 0 : index
    %46 = vector.load %arg10[%c0_15, %c0_16] : memref<64x256xf32, #tpu.memory_space<vmem>>, vector<8x256xf32>
    %47 = arith.addf %45, %46 : vector<8x256xf32>
    %48 = arith.mulf %47, %38 : vector<8x256xf32>
    %49 = math.tanh %48 : vector<8x256xf32>
    %50 = arith.mulf %49, %38 : vector<8x256xf32>
    %51 = arith.addf %50, %41 : vector<8x256xf32>
    %52 = vector.extract_strided_slice %51 {offsets = [0, 0], sizes = [8, 64], strides = [1, 1]} : vector<8x256xf32> to vector<8x64xf32>
    %53 = vector.extract_strided_slice %51 {offsets = [0, 64], sizes = [8, 64], strides = [1, 1]} : vector<8x256xf32> to vector<8x64xf32>
    %54 = vector.extract_strided_slice %51 {offsets = [0, 128], sizes = [8, 64], strides = [1, 1]} : vector<8x256xf32> to vector<8x64xf32>
    %55 = vector.extract_strided_slice %51 {offsets = [0, 192], sizes = [8, 64], strides = [1, 1]} : vector<8x256xf32> to vector<8x64xf32>
    %56 = arith.mulf %53, %43 : vector<8x64xf32>
    %57 = arith.mulf %52, %54 : vector<8x64xf32>
    %58 = arith.addf %56, %57 : vector<8x64xf32>
    %59 = math.tanh %58 : vector<8x64xf32>
    %60 = arith.mulf %55, %59 : vector<8x64xf32>
    %c0_17 = arith.constant 0 : index
    %c0_18 = arith.constant 0 : index
    %61 = vector.load %arg2[%c0_17, %c0_18] : memref<64x256xf32, #tpu.memory_space<vmem>>, vector<64x256xf32>
    %cst_19 = arith.constant dense<0.000000e+00> : vector<8x256xf32>
    %62 = tpu.matmul %60, %61, %cst_19 {dimension_numbers = #tpu.dot_dimension_numbers<[1], [0], [0], [1], [0, 0, 1, 1], [], []>} : vector<8x64xf32>, vector<64x256xf32>, vector<8x256xf32> -> vector<8x256xf32>
    %c8 = arith.constant 8 : index
    %c0_20 = arith.constant 0 : index
    %63 = vector.load %arg10[%c8, %c0_20] : memref<64x256xf32, #tpu.memory_space<vmem>>, vector<8x256xf32>
    %64 = arith.addf %62, %63 : vector<8x256xf32>
    %65 = arith.mulf %64, %38 : vector<8x256xf32>
    %66 = math.tanh %65 : vector<8x256xf32>
    %67 = arith.mulf %66, %38 : vector<8x256xf32>
    %68 = arith.addf %67, %41 : vector<8x256xf32>
    %69 = vector.extract_strided_slice %68 {offsets = [0, 0], sizes = [8, 64], strides = [1, 1]} : vector<8x256xf32> to vector<8x64xf32>
    %70 = vector.extract_strided_slice %68 {offsets = [0, 64], sizes = [8, 64], strides = [1, 1]} : vector<8x256xf32> to vector<8x64xf32>
    %71 = vector.extract_strided_slice %68 {offsets = [0, 128], sizes = [8, 64], strides = [1, 1]} : vector<8x256xf32> to vector<8x64xf32>
    %72 = vector.extract_strided_slice %68 {offsets = [0, 192], sizes = [8, 64], strides = [1, 1]} : vector<8x256xf32> to vector<8x64xf32>
    %73 = arith.mulf %70, %58 : vector<8x64xf32>
    %74 = arith.mulf %69, %71 : vector<8x64xf32>
    %75 = arith.addf %73, %74 : vector<8x64xf32>
    %76 = math.tanh %75 : vector<8x64xf32>
    %77 = arith.mulf %72, %76 : vector<8x64xf32>
    %c0_21 = arith.constant 0 : index
    %c0_22 = arith.constant 0 : index
    %78 = vector.load %arg2[%c0_21, %c0_22] : memref<64x256xf32, #tpu.memory_space<vmem>>, vector<64x256xf32>
    %cst_23 = arith.constant dense<0.000000e+00> : vector<8x256xf32>
    %79 = tpu.matmul %77, %78, %cst_23 {dimension_numbers = #tpu.dot_dimension_numbers<[1], [0], [0], [1], [0, 0, 1, 1], [], []>} : vector<8x64xf32>, vector<64x256xf32>, vector<8x256xf32> -> vector<8x256xf32>
    %c16 = arith.constant 16 : index
    %c0_24 = arith.constant 0 : index
    %80 = vector.load %arg10[%c16, %c0_24] : memref<64x256xf32, #tpu.memory_space<vmem>>, vector<8x256xf32>
    %81 = arith.addf %79, %80 : vector<8x256xf32>
    %82 = arith.mulf %81, %38 : vector<8x256xf32>
    %83 = math.tanh %82 : vector<8x256xf32>
    %84 = arith.mulf %83, %38 : vector<8x256xf32>
    %85 = arith.addf %84, %41 : vector<8x256xf32>
    %86 = vector.extract_strided_slice %85 {offsets = [0, 0], sizes = [8, 64], strides = [1, 1]} : vector<8x256xf32> to vector<8x64xf32>
    %87 = vector.extract_strided_slice %85 {offsets = [0, 64], sizes = [8, 64], strides = [1, 1]} : vector<8x256xf32> to vector<8x64xf32>
    %88 = vector.extract_strided_slice %85 {offsets = [0, 128], sizes = [8, 64], strides = [1, 1]} : vector<8x256xf32> to vector<8x64xf32>
    %89 = vector.extract_strided_slice %85 {offsets = [0, 192], sizes = [8, 64], strides = [1, 1]} : vector<8x256xf32> to vector<8x64xf32>
    %90 = arith.mulf %87, %75 : vector<8x64xf32>
    %91 = arith.mulf %86, %88 : vector<8x64xf32>
    %92 = arith.addf %90, %91 : vector<8x64xf32>
    %93 = math.tanh %92 : vector<8x64xf32>
    %94 = arith.mulf %89, %93 : vector<8x64xf32>
    %c0_25 = arith.constant 0 : index
    %c0_26 = arith.constant 0 : index
    %95 = vector.load %arg2[%c0_25, %c0_26] : memref<64x256xf32, #tpu.memory_space<vmem>>, vector<64x256xf32>
    %cst_27 = arith.constant dense<0.000000e+00> : vector<8x256xf32>
    %96 = tpu.matmul %94, %95, %cst_27 {dimension_numbers = #tpu.dot_dimension_numbers<[1], [0], [0], [1], [0, 0, 1, 1], [], []>} : vector<8x64xf32>, vector<64x256xf32>, vector<8x256xf32> -> vector<8x256xf32>
    %c24 = arith.constant 24 : index
    %c0_28 = arith.constant 0 : index
    %97 = vector.load %arg10[%c24, %c0_28] : memref<64x256xf32, #tpu.memory_space<vmem>>, vector<8x256xf32>
    %98 = arith.addf %96, %97 : vector<8x256xf32>
    %99 = arith.mulf %98, %38 : vector<8x256xf32>
    %100 = math.tanh %99 : vector<8x256xf32>
    %101 = arith.mulf %100, %38 : vector<8x256xf32>
    %102 = arith.addf %101, %41 : vector<8x256xf32>
    %103 = vector.extract_strided_slice %102 {offsets = [0, 0], sizes = [8, 64], strides = [1, 1]} : vector<8x256xf32> to vector<8x64xf32>
    %104 = vector.extract_strided_slice %102 {offsets = [0, 64], sizes = [8, 64], strides = [1, 1]} : vector<8x256xf32> to vector<8x64xf32>
    %105 = vector.extract_strided_slice %102 {offsets = [0, 128], sizes = [8, 64], strides = [1, 1]} : vector<8x256xf32> to vector<8x64xf32>
    %106 = vector.extract_strided_slice %102 {offsets = [0, 192], sizes = [8, 64], strides = [1, 1]} : vector<8x256xf32> to vector<8x64xf32>
    %107 = arith.mulf %104, %92 : vector<8x64xf32>
    %108 = arith.mulf %103, %105 : vector<8x64xf32>
    %109 = arith.addf %107, %108 : vector<8x64xf32>
    %110 = math.tanh %109 : vector<8x64xf32>
    %111 = arith.mulf %106, %110 : vector<8x64xf32>
    %c0_29 = arith.constant 0 : index
    %c0_30 = arith.constant 0 : index
    %112 = vector.load %arg2[%c0_29, %c0_30] : memref<64x256xf32, #tpu.memory_space<vmem>>, vector<64x256xf32>
    %cst_31 = arith.constant dense<0.000000e+00> : vector<8x256xf32>
    %113 = tpu.matmul %111, %112, %cst_31 {dimension_numbers = #tpu.dot_dimension_numbers<[1], [0], [0], [1], [0, 0, 1, 1], [], []>} : vector<8x64xf32>, vector<64x256xf32>, vector<8x256xf32> -> vector<8x256xf32>
    %c32 = arith.constant 32 : index
    %c0_32 = arith.constant 0 : index
    %114 = vector.load %arg10[%c32, %c0_32] : memref<64x256xf32, #tpu.memory_space<vmem>>, vector<8x256xf32>
    %115 = arith.addf %113, %114 : vector<8x256xf32>
    %116 = arith.mulf %115, %38 : vector<8x256xf32>
    %117 = math.tanh %116 : vector<8x256xf32>
    %118 = arith.mulf %117, %38 : vector<8x256xf32>
    %119 = arith.addf %118, %41 : vector<8x256xf32>
    %120 = vector.extract_strided_slice %119 {offsets = [0, 0], sizes = [8, 64], strides = [1, 1]} : vector<8x256xf32> to vector<8x64xf32>
    %121 = vector.extract_strided_slice %119 {offsets = [0, 64], sizes = [8, 64], strides = [1, 1]} : vector<8x256xf32> to vector<8x64xf32>
    %122 = vector.extract_strided_slice %119 {offsets = [0, 128], sizes = [8, 64], strides = [1, 1]} : vector<8x256xf32> to vector<8x64xf32>
    %123 = vector.extract_strided_slice %119 {offsets = [0, 192], sizes = [8, 64], strides = [1, 1]} : vector<8x256xf32> to vector<8x64xf32>
    %124 = arith.mulf %121, %109 : vector<8x64xf32>
    %125 = arith.mulf %120, %122 : vector<8x64xf32>
    %126 = arith.addf %124, %125 : vector<8x64xf32>
    %127 = math.tanh %126 : vector<8x64xf32>
    %128 = arith.mulf %123, %127 : vector<8x64xf32>
    %c0_33 = arith.constant 0 : index
    %c0_34 = arith.constant 0 : index
    %129 = vector.load %arg2[%c0_33, %c0_34] : memref<64x256xf32, #tpu.memory_space<vmem>>, vector<64x256xf32>
    %cst_35 = arith.constant dense<0.000000e+00> : vector<8x256xf32>
    %130 = tpu.matmul %128, %129, %cst_35 {dimension_numbers = #tpu.dot_dimension_numbers<[1], [0], [0], [1], [0, 0, 1, 1], [], []>} : vector<8x64xf32>, vector<64x256xf32>, vector<8x256xf32> -> vector<8x256xf32>
    %c40 = arith.constant 40 : index
    %c0_36 = arith.constant 0 : index
    %131 = vector.load %arg10[%c40, %c0_36] : memref<64x256xf32, #tpu.memory_space<vmem>>, vector<8x256xf32>
    %132 = arith.addf %130, %131 : vector<8x256xf32>
    %133 = arith.mulf %132, %38 : vector<8x256xf32>
    %134 = math.tanh %133 : vector<8x256xf32>
    %135 = arith.mulf %134, %38 : vector<8x256xf32>
    %136 = arith.addf %135, %41 : vector<8x256xf32>
    %137 = vector.extract_strided_slice %136 {offsets = [0, 0], sizes = [8, 64], strides = [1, 1]} : vector<8x256xf32> to vector<8x64xf32>
    %138 = vector.extract_strided_slice %136 {offsets = [0, 64], sizes = [8, 64], strides = [1, 1]} : vector<8x256xf32> to vector<8x64xf32>
    %139 = vector.extract_strided_slice %136 {offsets = [0, 128], sizes = [8, 64], strides = [1, 1]} : vector<8x256xf32> to vector<8x64xf32>
    %140 = vector.extract_strided_slice %136 {offsets = [0, 192], sizes = [8, 64], strides = [1, 1]} : vector<8x256xf32> to vector<8x64xf32>
    %141 = arith.mulf %138, %126 : vector<8x64xf32>
    %142 = arith.mulf %137, %139 : vector<8x64xf32>
    %143 = arith.addf %141, %142 : vector<8x64xf32>
    %144 = math.tanh %143 : vector<8x64xf32>
    %145 = arith.mulf %140, %144 : vector<8x64xf32>
    %c0_37 = arith.constant 0 : index
    %c0_38 = arith.constant 0 : index
    %146 = vector.load %arg2[%c0_37, %c0_38] : memref<64x256xf32, #tpu.memory_space<vmem>>, vector<64x256xf32>
    %cst_39 = arith.constant dense<0.000000e+00> : vector<8x256xf32>
    %147 = tpu.matmul %145, %146, %cst_39 {dimension_numbers = #tpu.dot_dimension_numbers<[1], [0], [0], [1], [0, 0, 1, 1], [], []>} : vector<8x64xf32>, vector<64x256xf32>, vector<8x256xf32> -> vector<8x256xf32>
    %c48 = arith.constant 48 : index
    %c0_40 = arith.constant 0 : index
    %148 = vector.load %arg10[%c48, %c0_40] : memref<64x256xf32, #tpu.memory_space<vmem>>, vector<8x256xf32>
    %149 = arith.addf %147, %148 : vector<8x256xf32>
    %150 = arith.mulf %149, %38 : vector<8x256xf32>
    %151 = math.tanh %150 : vector<8x256xf32>
    %152 = arith.mulf %151, %38 : vector<8x256xf32>
    %153 = arith.addf %152, %41 : vector<8x256xf32>
    %154 = vector.extract_strided_slice %153 {offsets = [0, 0], sizes = [8, 64], strides = [1, 1]} : vector<8x256xf32> to vector<8x64xf32>
    %155 = vector.extract_strided_slice %153 {offsets = [0, 64], sizes = [8, 64], strides = [1, 1]} : vector<8x256xf32> to vector<8x64xf32>
    %156 = vector.extract_strided_slice %153 {offsets = [0, 128], sizes = [8, 64], strides = [1, 1]} : vector<8x256xf32> to vector<8x64xf32>
    %157 = vector.extract_strided_slice %153 {offsets = [0, 192], sizes = [8, 64], strides = [1, 1]} : vector<8x256xf32> to vector<8x64xf32>
    %158 = arith.mulf %155, %143 : vector<8x64xf32>
    %159 = arith.mulf %154, %156 : vector<8x64xf32>
    %160 = arith.addf %158, %159 : vector<8x64xf32>
    %161 = math.tanh %160 : vector<8x64xf32>
    %162 = arith.mulf %157, %161 : vector<8x64xf32>
    %c0_41 = arith.constant 0 : index
    %c0_42 = arith.constant 0 : index
    %163 = vector.load %arg2[%c0_41, %c0_42] : memref<64x256xf32, #tpu.memory_space<vmem>>, vector<64x256xf32>
    %cst_43 = arith.constant dense<0.000000e+00> : vector<8x256xf32>
    %164 = tpu.matmul %162, %163, %cst_43 {dimension_numbers = #tpu.dot_dimension_numbers<[1], [0], [0], [1], [0, 0, 1, 1], [], []>} : vector<8x64xf32>, vector<64x256xf32>, vector<8x256xf32> -> vector<8x256xf32>
    %c56 = arith.constant 56 : index
    %c0_44 = arith.constant 0 : index
    %165 = vector.load %arg10[%c56, %c0_44] : memref<64x256xf32, #tpu.memory_space<vmem>>, vector<8x256xf32>
    %166 = arith.addf %164, %165 : vector<8x256xf32>
    %167 = arith.mulf %166, %38 : vector<8x256xf32>
    %168 = math.tanh %167 : vector<8x256xf32>
    %169 = arith.mulf %168, %38 : vector<8x256xf32>
    %170 = arith.addf %169, %41 : vector<8x256xf32>
    %171 = vector.extract_strided_slice %170 {offsets = [0, 0], sizes = [8, 64], strides = [1, 1]} : vector<8x256xf32> to vector<8x64xf32>
    %172 = vector.extract_strided_slice %170 {offsets = [0, 64], sizes = [8, 64], strides = [1, 1]} : vector<8x256xf32> to vector<8x64xf32>
    %173 = vector.extract_strided_slice %170 {offsets = [0, 128], sizes = [8, 64], strides = [1, 1]} : vector<8x256xf32> to vector<8x64xf32>
    %174 = vector.extract_strided_slice %170 {offsets = [0, 192], sizes = [8, 64], strides = [1, 1]} : vector<8x256xf32> to vector<8x64xf32>
    %175 = arith.mulf %172, %160 : vector<8x64xf32>
    %176 = arith.mulf %171, %173 : vector<8x64xf32>
    %177 = arith.addf %175, %176 : vector<8x64xf32>
    %178 = math.tanh %177 : vector<8x64xf32>
    %179 = arith.mulf %174, %178 : vector<8x64xf32>
    %180 = vector.extract_strided_slice %179 {offsets = [0, 0], sizes = [8, 32], strides = [1, 1]} : vector<8x64xf32> to vector<8x32xf32>
    %181 = vector.extract_strided_slice %179 {offsets = [0, 32], sizes = [8, 32], strides = [1, 1]} : vector<8x64xf32> to vector<8x32xf32>
    %182 = arith.addf %180, %181 : vector<8x32xf32>
    %183 = vector.extract_strided_slice %177 {offsets = [0, 0], sizes = [8, 32], strides = [1, 1]} : vector<8x64xf32> to vector<8x32xf32>
    %184 = vector.extract_strided_slice %177 {offsets = [0, 32], sizes = [8, 32], strides = [1, 1]} : vector<8x64xf32> to vector<8x32xf32>
    %185 = arith.addf %183, %184 : vector<8x32xf32>
    %c0_45 = arith.constant 0 : index
    %c0_46 = arith.constant 0 : index
    %186 = vector.load %arg4[%c0_45, %c0_46] : memref<2x128xf32, #tpu.memory_space<vmem>>, vector<2x128xf32>
    %187 = vector.extract_strided_slice %186 {offsets = [0, 0], sizes = [1, 128], strides = [1, 1]} : vector<2x128xf32> to vector<1x128xf32>
    %188 = vector.shape_cast %187 : vector<1x128xf32> to vector<1x128xf32>
    %189 = vector.broadcast %188 : vector<1x128xf32> to vector<8x128xf32>
    %190 = vector.extract_strided_slice %186 {offsets = [1, 0], sizes = [1, 128], strides = [1, 1]} : vector<2x128xf32> to vector<1x128xf32>
    %191 = vector.shape_cast %190 : vector<1x128xf32> to vector<1x128xf32>
    %192 = vector.broadcast %191 : vector<1x128xf32> to vector<8x128xf32>
    %c0_47 = arith.constant 0 : index
    %c0_48 = arith.constant 0 : index
    %193 = vector.load %arg6[%c0_47, %c0_48] : memref<1x128xf32, #tpu.memory_space<vmem>>, vector<1x128xf32>
    %194 = vector.shape_cast %193 : vector<1x128xf32> to vector<1x128xf32>
    %195 = vector.broadcast %194 : vector<1x128xf32> to vector<8x128xf32>
    %c0_49 = arith.constant 0 : index
    %c0_50 = arith.constant 0 : index
    %196 = vector.load %arg8[%c0_49, %c0_50] : memref<1x2xf32, #tpu.memory_space<vmem>>, vector<1x2xf32>
    %197 = vector.shape_cast %196 : vector<1x2xf32> to vector<1x2xf32>
    %198 = vector.broadcast %197 : vector<1x2xf32> to vector<8x2xf32>
    %199 = tpu.iota {dimensions = array<i32: 1>} : vector<8x128xi32>
    %c64_i32 = arith.constant 64 : i32
    %200 = vector.broadcast %c64_i32 : i32 to vector<8x128xi32>
    %201 = arith.cmpi sge, %199, %200 : vector<8x128xi32>
    %c96_i32 = arith.constant 96 : i32
    %202 = vector.broadcast %c96_i32 : i32 to vector<8x128xi32>
    %203 = arith.cmpi slt, %199, %202 : vector<8x128xi32>
    %204 = arith.andi %201, %203 : vector<8x128xi1>
    %cst_51 = arith.constant 1.000000e+00 : f32
    %cst_52 = arith.constant 5.000000e-01 : f32
    %205 = vector.broadcast %cst_51 : f32 to vector<8x128xf32>
    %206 = vector.broadcast %cst_52 : f32 to vector<8x128xf32>
    %207 = arith.select %204, %205, %206 : vector<8x128xi1>, vector<8x128xf32>
    %cst_53 = arith.constant 0.000000e+00 : f32
    %cst_54 = arith.constant 5.000000e-01 : f32
    %208 = vector.broadcast %cst_53 : f32 to vector<8x128xf32>
    %209 = vector.broadcast %cst_54 : f32 to vector<8x128xf32>
    %210 = arith.select %204, %208, %209 : vector<8x128xi1>, vector<8x128xf32>
    %c56_55 = arith.constant 56 : index
    %c2 = arith.constant 2 : index
    %211 = vector.load %arg0[%c56_55, %c2] : memref<64x4xf32, #tpu.memory_space<vmem>>, vector<8x2xf32>
    %212 = vector.extract_strided_slice %211 {offsets = [0, 0], sizes = [8, 1], strides = [1, 1]} : vector<8x2xf32> to vector<8x1xf32>
    %213 = vector.broadcast %212 : vector<8x1xf32> to vector<8x128xf32>
    %214 = arith.mulf %213, %189 : vector<8x128xf32>
    %215 = vector.extract_strided_slice %211 {offsets = [0, 1], sizes = [8, 1], strides = [1, 1]} : vector<8x2xf32> to vector<8x1xf32>
    %216 = vector.broadcast %215 : vector<8x1xf32> to vector<8x128xf32>
    %217 = arith.mulf %216, %192 : vector<8x128xf32>
    %218 = arith.addf %214, %217 : vector<8x128xf32>
    %c0_56 = arith.constant 0 : index
    %c0_57 = arith.constant 0 : index
    %219 = vector.load %arg5[%c0_56, %c0_57] : memref<32x128xf32, #tpu.memory_space<vmem>>, vector<32x128xf32>
    %cst_58 = arith.constant dense<0.000000e+00> : vector<8x128xf32>
    %220 = tpu.matmul %182, %219, %cst_58 {dimension_numbers = #tpu.dot_dimension_numbers<[1], [0], [0], [1], [0, 0, 1, 1], [], []>} : vector<8x32xf32>, vector<32x128xf32>, vector<8x128xf32> -> vector<8x128xf32>
    %221 = arith.addf %218, %220 : vector<8x128xf32>
    %222 = arith.addf %221, %195 : vector<8x128xf32>
    %223 = arith.mulf %222, %207 : vector<8x128xf32>
    %224 = math.tanh %223 : vector<8x128xf32>
    %225 = arith.mulf %224, %207 : vector<8x128xf32>
    %226 = arith.addf %225, %210 : vector<8x128xf32>
    %227 = vector.extract_strided_slice %226 {offsets = [0, 0], sizes = [8, 32], strides = [1, 1]} : vector<8x128xf32> to vector<8x32xf32>
    %228 = vector.extract_strided_slice %226 {offsets = [0, 32], sizes = [8, 32], strides = [1, 1]} : vector<8x128xf32> to vector<8x32xf32>
    %229 = vector.extract_strided_slice %226 {offsets = [0, 64], sizes = [8, 32], strides = [1, 1]} : vector<8x128xf32> to vector<8x32xf32>
    %230 = vector.extract_strided_slice %226 {offsets = [0, 96], sizes = [8, 32], strides = [1, 1]} : vector<8x128xf32> to vector<8x32xf32>
    %231 = arith.mulf %228, %185 : vector<8x32xf32>
    %232 = arith.mulf %227, %229 : vector<8x32xf32>
    %233 = arith.addf %231, %232 : vector<8x32xf32>
    %234 = math.tanh %233 : vector<8x32xf32>
    %235 = arith.mulf %230, %234 : vector<8x32xf32>
    %c0_59 = arith.constant 0 : index
    %c0_60 = arith.constant 0 : index
    %236 = vector.load %arg7[%c0_59, %c0_60] : memref<32x2xf32, #tpu.memory_space<vmem>>, vector<32x2xf32>
    %cst_61 = arith.constant dense<0.000000e+00> : vector<8x2xf32>
    %237 = tpu.matmul %235, %236, %cst_61 {dimension_numbers = #tpu.dot_dimension_numbers<[1], [0], [0], [1], [0, 0, 1, 1], [], []>} : vector<8x32xf32>, vector<32x2xf32>, vector<8x2xf32> -> vector<8x2xf32>
    %238 = arith.addf %237, %198 : vector<8x2xf32>
    %cst_62 = arith.constant -1.000000e+00 : f32
    %cst_63 = arith.constant 1.000000e+00 : f32
    %239 = vector.broadcast %cst_62 : f32 to vector<8x2xf32>
    %240 = arith.maximumf %239, %238 : vector<8x2xf32>
    %241 = vector.broadcast %cst_63 : f32 to vector<8x2xf32>
    %242 = arith.minimumf %241, %240 : vector<8x2xf32>
    %c0_64 = arith.constant 0 : index
    %c0_65 = arith.constant 0 : index
    %243 = vector.load %arg9[%c0_64, %c0_65] : memref<8x8xf32, #tpu.memory_space<vmem>>, vector<8x2xf32>
    tpu.vector_store %arg9[%c0_64, %c0_65], %242 {strides = array<i32>} : memref<8x8xf32, #tpu.memory_space<vmem>>, vector<8x2xf32>,
    %244 = vector.extract_strided_slice %242 {offsets = [0, 0], sizes = [8, 1], strides = [1, 1]} : vector<8x2xf32> to vector<8x1xf32>
    %245 = vector.broadcast %244 : vector<8x1xf32> to vector<8x128xf32>
    %246 = arith.mulf %245, %189 : vector<8x128xf32>
    %247 = vector.extract_strided_slice %242 {offsets = [0, 1], sizes = [8, 1], strides = [1, 1]} : vector<8x2xf32> to vector<8x1xf32>
    %248 = vector.broadcast %247 : vector<8x1xf32> to vector<8x128xf32>
    %249 = arith.mulf %248, %192 : vector<8x128xf32>
    %250 = arith.addf %246, %249 : vector<8x128xf32>
    %c0_66 = arith.constant 0 : index
    %c0_67 = arith.constant 0 : index
    %251 = vector.load %arg5[%c0_66, %c0_67] : memref<32x128xf32, #tpu.memory_space<vmem>>, vector<32x128xf32>
    %cst_68 = arith.constant dense<0.000000e+00> : vector<8x128xf32>
    %252 = tpu.matmul %235, %251, %cst_68 {dimension_numbers = #tpu.dot_dimension_numbers<[1], [0], [0], [1], [0, 0, 1, 1], [], []>} : vector<8x32xf32>, vector<32x128xf32>, vector<8x128xf32> -> vector<8x128xf32>
    %253 = arith.addf %250, %252 : vector<8x128xf32>
    %254 = arith.addf %253, %195 : vector<8x128xf32>
    %255 = arith.mulf %254, %207 : vector<8x128xf32>
    %256 = math.tanh %255 : vector<8x128xf32>
    %257 = arith.mulf %256, %207 : vector<8x128xf32>
    %258 = arith.addf %257, %210 : vector<8x128xf32>
    %259 = vector.extract_strided_slice %258 {offsets = [0, 0], sizes = [8, 32], strides = [1, 1]} : vector<8x128xf32> to vector<8x32xf32>
    %260 = vector.extract_strided_slice %258 {offsets = [0, 32], sizes = [8, 32], strides = [1, 1]} : vector<8x128xf32> to vector<8x32xf32>
    %261 = vector.extract_strided_slice %258 {offsets = [0, 64], sizes = [8, 32], strides = [1, 1]} : vector<8x128xf32> to vector<8x32xf32>
    %262 = vector.extract_strided_slice %258 {offsets = [0, 96], sizes = [8, 32], strides = [1, 1]} : vector<8x128xf32> to vector<8x32xf32>
    %263 = arith.mulf %260, %233 : vector<8x32xf32>
    %264 = arith.mulf %259, %261 : vector<8x32xf32>
    %265 = arith.addf %263, %264 : vector<8x32xf32>
    %266 = math.tanh %265 : vector<8x32xf32>
    %267 = arith.mulf %262, %266 : vector<8x32xf32>
    %c0_69 = arith.constant 0 : index
    %c0_70 = arith.constant 0 : index
    %268 = vector.load %arg7[%c0_69, %c0_70] : memref<32x2xf32, #tpu.memory_space<vmem>>, vector<32x2xf32>
    %cst_71 = arith.constant dense<0.000000e+00> : vector<8x2xf32>
    %269 = tpu.matmul %267, %268, %cst_71 {dimension_numbers = #tpu.dot_dimension_numbers<[1], [0], [0], [1], [0, 0, 1, 1], [], []>} : vector<8x32xf32>, vector<32x2xf32>, vector<8x2xf32> -> vector<8x2xf32>
    %270 = arith.addf %269, %198 : vector<8x2xf32>
    %cst_72 = arith.constant -1.000000e+00 : f32
    %cst_73 = arith.constant 1.000000e+00 : f32
    %271 = vector.broadcast %cst_72 : f32 to vector<8x2xf32>
    %272 = arith.maximumf %271, %270 : vector<8x2xf32>
    %273 = vector.broadcast %cst_73 : f32 to vector<8x2xf32>
    %274 = arith.minimumf %273, %272 : vector<8x2xf32>
    %c0_74 = arith.constant 0 : index
    %c2_75 = arith.constant 2 : index
    %275 = vector.load %arg9[%c0_74, %c2_75] : memref<8x8xf32, #tpu.memory_space<vmem>>, vector<8x2xf32>
    tpu.vector_store %arg9[%c0_74, %c2_75], %274 {strides = array<i32>} : memref<8x8xf32, #tpu.memory_space<vmem>>, vector<8x2xf32>,
    %276 = vector.extract_strided_slice %274 {offsets = [0, 0], sizes = [8, 1], strides = [1, 1]} : vector<8x2xf32> to vector<8x1xf32>
    %277 = vector.broadcast %276 : vector<8x1xf32> to vector<8x128xf32>
    %278 = arith.mulf %277, %189 : vector<8x128xf32>
    %279 = vector.extract_strided_slice %274 {offsets = [0, 1], sizes = [8, 1], strides = [1, 1]} : vector<8x2xf32> to vector<8x1xf32>
    %280 = vector.broadcast %279 : vector<8x1xf32> to vector<8x128xf32>
    %281 = arith.mulf %280, %192 : vector<8x128xf32>
    %282 = arith.addf %278, %281 : vector<8x128xf32>
    %c0_76 = arith.constant 0 : index
    %c0_77 = arith.constant 0 : index
    %283 = vector.load %arg5[%c0_76, %c0_77] : memref<32x128xf32, #tpu.memory_space<vmem>>, vector<32x128xf32>
    %cst_78 = arith.constant dense<0.000000e+00> : vector<8x128xf32>
    %284 = tpu.matmul %267, %283, %cst_78 {dimension_numbers = #tpu.dot_dimension_numbers<[1], [0], [0], [1], [0, 0, 1, 1], [], []>} : vector<8x32xf32>, vector<32x128xf32>, vector<8x128xf32> -> vector<8x128xf32>
    %285 = arith.addf %282, %284 : vector<8x128xf32>
    %286 = arith.addf %285, %195 : vector<8x128xf32>
    %287 = arith.mulf %286, %207 : vector<8x128xf32>
    %288 = math.tanh %287 : vector<8x128xf32>
    %289 = arith.mulf %288, %207 : vector<8x128xf32>
    %290 = arith.addf %289, %210 : vector<8x128xf32>
    %291 = vector.extract_strided_slice %290 {offsets = [0, 0], sizes = [8, 32], strides = [1, 1]} : vector<8x128xf32> to vector<8x32xf32>
    %292 = vector.extract_strided_slice %290 {offsets = [0, 32], sizes = [8, 32], strides = [1, 1]} : vector<8x128xf32> to vector<8x32xf32>
    %293 = vector.extract_strided_slice %290 {offsets = [0, 64], sizes = [8, 32], strides = [1, 1]} : vector<8x128xf32> to vector<8x32xf32>
    %294 = vector.extract_strided_slice %290 {offsets = [0, 96], sizes = [8, 32], strides = [1, 1]} : vector<8x128xf32> to vector<8x32xf32>
    %295 = arith.mulf %292, %265 : vector<8x32xf32>
    %296 = arith.mulf %291, %293 : vector<8x32xf32>
    %297 = arith.addf %295, %296 : vector<8x32xf32>
    %298 = math.tanh %297 : vector<8x32xf32>
    %299 = arith.mulf %294, %298 : vector<8x32xf32>
    %c0_79 = arith.constant 0 : index
    %c0_80 = arith.constant 0 : index
    %300 = vector.load %arg7[%c0_79, %c0_80] : memref<32x2xf32, #tpu.memory_space<vmem>>, vector<32x2xf32>
    %cst_81 = arith.constant dense<0.000000e+00> : vector<8x2xf32>
    %301 = tpu.matmul %299, %300, %cst_81 {dimension_numbers = #tpu.dot_dimension_numbers<[1], [0], [0], [1], [0, 0, 1, 1], [], []>} : vector<8x32xf32>, vector<32x2xf32>, vector<8x2xf32> -> vector<8x2xf32>
    %302 = arith.addf %301, %198 : vector<8x2xf32>
    %cst_82 = arith.constant -1.000000e+00 : f32
    %cst_83 = arith.constant 1.000000e+00 : f32
    %303 = vector.broadcast %cst_82 : f32 to vector<8x2xf32>
    %304 = arith.maximumf %303, %302 : vector<8x2xf32>
    %305 = vector.broadcast %cst_83 : f32 to vector<8x2xf32>
    %306 = arith.minimumf %305, %304 : vector<8x2xf32>
    %c0_84 = arith.constant 0 : index
    %c4 = arith.constant 4 : index
    %307 = vector.load %arg9[%c0_84, %c4] : memref<8x8xf32, #tpu.memory_space<vmem>>, vector<8x2xf32>
    tpu.vector_store %arg9[%c0_84, %c4], %306 {strides = array<i32>} : memref<8x8xf32, #tpu.memory_space<vmem>>, vector<8x2xf32>,
    %308 = vector.extract_strided_slice %306 {offsets = [0, 0], sizes = [8, 1], strides = [1, 1]} : vector<8x2xf32> to vector<8x1xf32>
    %309 = vector.broadcast %308 : vector<8x1xf32> to vector<8x128xf32>
    %310 = arith.mulf %309, %189 : vector<8x128xf32>
    %311 = vector.extract_strided_slice %306 {offsets = [0, 1], sizes = [8, 1], strides = [1, 1]} : vector<8x2xf32> to vector<8x1xf32>
    %312 = vector.broadcast %311 : vector<8x1xf32> to vector<8x128xf32>
    %313 = arith.mulf %312, %192 : vector<8x128xf32>
    %314 = arith.addf %310, %313 : vector<8x128xf32>
    %c0_85 = arith.constant 0 : index
    %c0_86 = arith.constant 0 : index
    %315 = vector.load %arg5[%c0_85, %c0_86] : memref<32x128xf32, #tpu.memory_space<vmem>>, vector<32x128xf32>
    %cst_87 = arith.constant dense<0.000000e+00> : vector<8x128xf32>
    %316 = tpu.matmul %299, %315, %cst_87 {dimension_numbers = #tpu.dot_dimension_numbers<[1], [0], [0], [1], [0, 0, 1, 1], [], []>} : vector<8x32xf32>, vector<32x128xf32>, vector<8x128xf32> -> vector<8x128xf32>
    %317 = arith.addf %314, %316 : vector<8x128xf32>
    %318 = arith.addf %317, %195 : vector<8x128xf32>
    %319 = arith.mulf %318, %207 : vector<8x128xf32>
    %320 = math.tanh %319 : vector<8x128xf32>
    %321 = arith.mulf %320, %207 : vector<8x128xf32>
    %322 = arith.addf %321, %210 : vector<8x128xf32>
    %323 = vector.extract_strided_slice %322 {offsets = [0, 0], sizes = [8, 32], strides = [1, 1]} : vector<8x128xf32> to vector<8x32xf32>
    %324 = vector.extract_strided_slice %322 {offsets = [0, 32], sizes = [8, 32], strides = [1, 1]} : vector<8x128xf32> to vector<8x32xf32>
    %325 = vector.extract_strided_slice %322 {offsets = [0, 64], sizes = [8, 32], strides = [1, 1]} : vector<8x128xf32> to vector<8x32xf32>
    %326 = vector.extract_strided_slice %322 {offsets = [0, 96], sizes = [8, 32], strides = [1, 1]} : vector<8x128xf32> to vector<8x32xf32>
    %327 = arith.mulf %324, %297 : vector<8x32xf32>
    %328 = arith.mulf %323, %325 : vector<8x32xf32>
    %329 = arith.addf %327, %328 : vector<8x32xf32>
    %330 = math.tanh %329 : vector<8x32xf32>
    %331 = arith.mulf %326, %330 : vector<8x32xf32>
    %c0_88 = arith.constant 0 : index
    %c0_89 = arith.constant 0 : index
    %332 = vector.load %arg7[%c0_88, %c0_89] : memref<32x2xf32, #tpu.memory_space<vmem>>, vector<32x2xf32>
    %cst_90 = arith.constant dense<0.000000e+00> : vector<8x2xf32>
    %333 = tpu.matmul %331, %332, %cst_90 {dimension_numbers = #tpu.dot_dimension_numbers<[1], [0], [0], [1], [0, 0, 1, 1], [], []>} : vector<8x32xf32>, vector<32x2xf32>, vector<8x2xf32> -> vector<8x2xf32>
    %334 = arith.addf %333, %198 : vector<8x2xf32>
    %cst_91 = arith.constant -1.000000e+00 : f32
    %cst_92 = arith.constant 1.000000e+00 : f32
    %335 = vector.broadcast %cst_91 : f32 to vector<8x2xf32>
    %336 = arith.maximumf %335, %334 : vector<8x2xf32>
    %337 = vector.broadcast %cst_92 : f32 to vector<8x2xf32>
    %338 = arith.minimumf %337, %336 : vector<8x2xf32>
    %c0_93 = arith.constant 0 : index
    %c6 = arith.constant 6 : index
    %339 = vector.load %arg9[%c0_93, %c6] : memref<8x8xf32, #tpu.memory_space<vmem>>, vector<8x2xf32>
    tpu.vector_store %arg9[%c0_93, %c6], %338 {strides = array<i32>} : memref<8x8xf32, #tpu.memory_space<vmem>>, vector<8x2xf32>,
    return
  }
}

</mosaic_0001>

<bundles_post_ra>
// kernel: de_global_posetrack.1
= control target key start
LH: loop header
LB: loop body
LE: loop exit
PB: predicated region body
PF: predicated region fallthrough
CT: control target
= control target key end

     0   :  { %v2465_v3 = vmov 0.0   ;;  %v2466_v4 = vmov 0   ;;  %v2467_v9 = vmov 2   ;;  %v2468_v27 = vmov 1   ;;  %s2478_s18 = smov 6   ;;  %s3087_s2 = inlined_call_operand.vmem [shape: f32[64,256], index: 2, kind: input, shape index: {}]   ;;  %s3088_s0 = inlined_call_operand.vmem [shape: f32[64,4], index: 0, kind: input, shape index: {}]   ;;  %s3089_s1 = inlined_call_operand.vmem [shape: f32[4,256], index: 1, kind: input, shape index: {}]   ;;  %s3090_s3 = inlined_call_operand.vmem [shape: f32[1,256], index: 3, kind: input, shape index: {}]   ;;  %s3091_s5 = inlined_call_operand.vmem [shape: f32[32,128], index: 5, kind: input, shape index: {}]   ;;  %s3092_s4 = inlined_call_operand.vmem [shape: f32[2,128], index: 4, kind: input, shape index: {}]   ;;  %s3093_s6 = inlined_call_operand.vmem [shape: f32[1,128], index: 6, kind: input, shape index: {}]   ;;  %s3094_s7 = inlined_call_operand.vmem [shape: f32[32,2], index: 7, kind: input, shape index: {}]   ;;  %s3095_s8 = inlined_call_operand.vmem [shape: f32[1,2], index: 8, kind: input, shape index: {}]   ;;  %s3096_s9 = inlined_call_operand.vmem [shape: f32[8,8], index: 9, kind: output, shape index: {}]  }
   0x1   :  { %v420_v0 = vld [vmem:[%s3087_s2 + $0x8] sm:$0xff]  ;;  %v422_v1 = vld [vmem:[%s3087_s2 + $0x18] sm:$0xff]  ;;  %v419_v2 = vld [vmem:[%s3087_s2] sm:$0xff]  ;;  %505 = vmatprep.mubr.f32.mxu0 %v2465_v3  ;;  %2364 = vset.pattern.permute.xlu0 %v2466_v4  ;;  %v2469_v28 = vmov 3   ;;  %v43_v30 = vlaneseq  ;;  %vm437_vm1 = vcmask 523264   ;;  %vm2474_vm2 = vmmov 0  }
   0x2   :  { %v2540_v5 = vpack.c.bf16 %v422_v1, %v420_v0  ;;  %v421_v6 = vld [vmem:[%s3087_s2 + $0x10] sm:$0xff]  ;;  %v424_v7 = vld [vmem:[%s3087_s2 + $0x28] sm:$0xff]  ;;  %v426_v8 = vld [vmem:[%s3087_s2 + $0x38] sm:$0xff]  ;;  %2366 = vset.pattern.permute.xlu1 %v2467_v9  ;;  %600 = vmatprep.mubr.f32.mxu1 %v2465_v3  ;;  %vm1252_vm3 = vcmask 261120   ;;  %vm1433_vm7 = vcmask 15360   ;;  %vm1629_vm8 = vcmask 31760  }
   0x3   :  { %v2553_v10 = vpack.c.bf16 %v421_v6, %v419_v2  ;;  %v2555_v11 = vpack.c.bf16 %v426_v8, %v424_v7  ;;  %v423_v12 = vld [vmem:[%s3087_s2 + $0x20] sm:$0xff]  ;;  %v425_v13 = vld [vmem:[%s3087_s2 + $0x30] sm:$0xff]  ;;  %v428_v14 = vld [vmem:[%s3087_s2 + $0x48] sm:$0xff]  ;;  %v44_v31 = vshrl.u32 %v43_v30, 7  ;;  %v2671_v6 = vand.u32 127, %v43_v30 }
   0x4   :  { %2175 = vmatprep.subr.bf16.mxu0 %v2540_v5  ;;  %v430_v15 = vld [vmem:[%s3087_s2 + $0x58] sm:$0xff]  ;;  %2191 = vmatprep.subr.bf16.mxu1 %v2540_v5  ;;  %v2572_v16 = vpack.c.bf16 %v425_v13, %v423_v12  ;;  %v427_v18 = vld [vmem:[%s3087_s2 + $0x40] sm:$0xff]  ;;  %v429_v19 = vld [vmem:[%s3087_s2 + $0x50] sm:$0xff]  ;;  %vm1824_vm9 = vcmask 48160   ;;  %vm2019_vm10 = vcmask 64560  }
   0x5   :  { %2177 = vmatpush1.bf16.msra.mxu0 %v2553_v10  ;;  %2193 = vmatpush1.bf16.msra.mxu1 %v2553_v10  ;;  %v2576_v17 = vpack.c.bf16 %v430_v15, %v428_v14  ;;  %v32_v20 = vld [vmem:[%s3088_s0] sm:$0xff]  ;;  %v432_v21 = vld [vmem:[%s3087_s2 + $0x68] sm:$0xff]  ;;  %v434_v22 = vld [vmem:[%s3087_s2 + $0x78] sm:$0xff]  ;;  %v2595_v23 = vpack.c.bf16 %v429_v19, %v427_v18  ;;  %v2631_v32 = vsub.s32 0, %v44_v31  ;;  %v100_v34 = vsub.s32 4, %v44_v31 }
   0x6   :  { %2179 = vmatprep.subr.bf16.mxu0 %v2555_v11  ;;  %2195 = vmatprep.subr.bf16.mxu1 %v2555_v11  ;;  %v2599_v24 = vpack.c.bf16 %v434_v22, %v432_v21  ;;  %v431_v25 = vld [vmem:[%s3087_s2 + $0x60] sm:$0xff]  ;;  %v433_v26 = vld [vmem:[%s3087_s2 + $0x70] sm:$0xff]  ;;  %v2636_v35 = vsub.s32 1, %v44_v31  ;;  %v182_v38 = vsub.s32 5, %v44_v31  ;;  %v260_v42 = vsub.s32 2, %v44_v31 }
   0x7   :  { %55 = vperm.xlu0 %2364, %v32_v20   ;;  %227 = vperm.xlu1 %2366, %v32_v20   ;;  %v2611_v29 = vpack.c.bf16 %v433_v26, %v431_v25  ;;  %v40_v33 = vld [vmem:[%s3089_s1] sm:$0xff]  ;;  %v264_v45 = vsub.s32 6, %v44_v31  ;;  %v342_v52 = vsub.s32 3, %v44_v31  ;;  %v346_v57 = vsub.s32 7, %v44_v31  ;;  %s2471_s1 = smov 64  }
   0x8   :  { %v97_v36 = vrot.slane %v40_v33, %v2631_v32  ;;  %v101_v37 = vrot.slane %v40_v33, %v100_v34  ;;  %v41_v40 = vld [vmem:[%s3090_s3] sm:$0x3]  ;;  %v179_v43 = vrot.slane %v40_v33, %v2636_v35  ;;  %v183_v46 = vrot.slane %v40_v33, %v182_v38 }
   0x9   :  { %2181 = vmatpush1.bf16.msra.mxu0 %v2572_v16  ;;  %2197 = vmatpush1.bf16.msra.mxu1 %v2572_v16  ;;  %v2650_v47 = vrot.slane %v41_v40, %v2631_v32  ;;  %v2653_v48 = vrot.slane %v41_v40, %v2636_v35  ;;  %v261_v50 = vrot.slane %v40_v33, %v260_v42  ;;  %v408_v19 = vadd.s32 128, %v2671_v6 }
   0xa   :  { %2183 = vmatprep.subr.bf16.mxu0 %v2576_v17  ;;  %2199 = vmatprep.subr.bf16.mxu1 %v2576_v17  ;;  %v2643_v41 = vrot.slane %v97_v36, %v2631_v32  ;;  %v2647_v44 = vrot.slane %v101_v37, %v2631_v32  ;;  %v2657_v51 = vrot.slane %v179_v43, %v2636_v35  ;;  %v2470_v34 = vmov 0.5  }
   0xb   :  { %2365 = vset.pattern.permute.xlu0 %v2468_v27  ;;  %2367 = vset.pattern.permute.xlu1 %v2469_v28  ;;  %v265_v54 = vrot.slane %v40_v33, %v264_v45  ;;  %v2661_v55 = vrot.slane %v183_v46, %v2636_v35  ;;  %v2664_v60 = vrot.slane %v261_v50, %v260_v42  ;;  %vm412_vm0 = vcmp.lt.s32.totalorder %v408_v19, 192 }
   0xc   :  { %145 = vperm.xlu0 %2365, %v32_v20   ;;  %309 = vperm.xlu1 %2367, %v32_v20   ;;  %v343_v62 = vrot.slane %v40_v33, %v342_v52  ;;  %v347_v2 = vrot.slane %v40_v33, %v346_v57  ;;  %v2684_v36 = vsel %vm412_vm0, 1.0, %v2470_v34  ;;  %v2689_v46 = vsel %vm412_vm0, 0.0, %v2470_v34 }
   0xd   :  { %2185 = vmatpush1.bf16.msra.mxu0 %v2595_v23  ;;  %2201 = vmatpush1.bf16.msra.mxu1 %v2595_v23  ;;  %v2668_v0 = vrot.slane %v265_v54, %v260_v42  ;;  %v33_v54 = vld [vmem:[%s3088_s0 + $0x8] sm:$0xff]  ;;  %vm1227_vm4 = vcmp.ge.s32.totalorder %v2671_v6, 64  ;;  %vm1228_vm5 = vcmp.lt.s32.totalorder %v2671_v6, 96 }
   0xe   :  { %2187 = vmatprep.subr.bf16.mxu0 %v2599_v24  ;;  %2203 = vmatprep.subr.bf16.mxu1 %v2599_v24  ;;  %v2674_v12 = vrot.slane %v343_v62, %v342_v52  ;;  %v2677_v15 = vrot.slane %v347_v2, %v342_v52  ;;  %vm1229_vm6 = vmand %vm1227_vm4, %vm1228_vm5 }
  0x10   :  { %2368 = vset.pattern.permute.xlu1 %v2466_v4 }
  0x11   :  { %2189 = vmatpush1.bf16.msra.mxu0 %v2611_v29  ;;  %2205 = vmatpush1.bf16.msra.mxu1 %v2611_v29 }
  0x12   :  { %2207 = vmatprep.subr.bf16.mxu0 %v2540_v5  ;;  %2223 = vmatprep.subr.bf16.mxu1 %v2540_v5 }
  0x14   :  { %506 = vmatmul.mubr.f32.vlgmr.msra.gmra.mrb[0].mxu0 %v2465_v3 }
  0x15   :  { %2209 = vmatpush1.bf16.msra.mxu0 %v2553_v10  ;;  %695 = vmatprep.mubr.f32.mxu0 %v2465_v3 }
  0x16   :  { %2211 = vmatprep.subr.bf16.mxu0 %v2555_v11 }
  0x19   :  { %2213 = vmatpush1.bf16.msra.mxu0 %v2572_v16 }
  0x1a   :  { %2215 = vmatprep.subr.bf16.mxu0 %v2576_v17 }
  0x1d   :  { %2217 = vmatpush1.bf16.msra.mxu0 %v2595_v23 }
  0x1e   :  { %2219 = vmatprep.subr.bf16.mxu0 %v2599_v24 }
  0x21   :  { %2221 = vmatpush1.bf16.msra.mxu0 %v2611_v29 }
  0x22   :  { %2239 = vmatprep.subr.bf16.mxu0 %v2540_v5 }
  0x86   :  { %v56_v39 = vpop.permute.xlu0 %55  ;;  %v228_v58 = vpop.permute.xlu1 %227 }
  0x87   :  { %v112_v49 = vmul.f32 %v2643_v41, %v56_v39  ;;  %v113_v53 = vmul.f32 %v2647_v44, %v56_v39  ;;  %v276_v7 = vmul.f32 %v2664_v60, %v228_v58  ;;  %v277_v13 = vmul.f32 %v2668_v0, %v228_v58 }
  0x89   :  { %v128_v59 = vadd.f32 %v112_v49, %v2650_v47  ;;  %v129_v63 = vadd.f32 %v113_v53, %v2653_v48 }
  0x8b   :  { %v146_v56 = vpop.permute.xlu0 %145  ;;  %v310_v18 = vpop.permute.xlu1 %309 }
  0x8c   :  { %v194_v61 = vmul.f32 %v2657_v51, %v146_v56  ;;  %v195_v1 = vmul.f32 %v2661_v55, %v146_v56  ;;  %v358_v20 = vmul.f32 %v2674_v12, %v310_v18  ;;  %v359_v22 = vmul.f32 %v2677_v15, %v310_v18 }
  0x8e   :  { %v210_v8 = vadd.f32 %v194_v61, %v128_v59  ;;  %v211_v14 = vadd.f32 %v195_v1, %v129_v63 }
  0x90   :  { %v292_v21 = vadd.f32 %v276_v7, %v210_v8  ;;  %v293_v25 = vadd.f32 %v277_v13, %v211_v14 }
  0x92   :  { %v374_v26 = vadd.f32 %v358_v20, %v292_v21  ;;  %v375_v31 = vadd.f32 %v359_v22, %v293_v25 }
  0xe7   :  { %v507_v30 = vpop.f32.mrb[0].mxu0 }
  0xe8   :  { %v508_v33 = vadd.f32 %v507_v30, %v374_v26  ;;  %v509_v37 = vpop.f32.mrb[1].mxu0 }
  0xe9   :  { %v510_v38 = vadd.f32 %v509_v37, %v375_v31 }
  0xea   :  { %v512_v39 = vmul.f32 0.5, %v508_v33 }
  0xeb   :  { %v513_v40 = vmul.f32 %v510_v38, %v2684_v36 }
  0xec   :  { %2401 = vtanh.f32 %v512_v39 }
  0xed   :  { %2403 = vtanh.f32 %v513_v40 }
  0xf6   :  { %v2402_v42 = vpop.eup %2401 }
  0xf7   :  { %v2404_v43 = vpop.eup %2403  ;;  %v516_v45 = vmul.f32 0.5, %v2402_v42 }
  0xf8   :  { %v517_v49 = vmul.f32 %v2404_v43, %v2684_v36 }
  0xf9   :  { %v518_v50 = vadd.f32 0.5, %v516_v45 }
  0xfa   :  { %v519_v52 = vadd.f32 %v517_v49, %v2689_v46 }
  0xfb   :  { %v520_v56 = vmul.f32 0.0, %v518_v50 }
  0xfc   :  { %v521_v53 = vmul.f32 %v519_v52, %v518_v50 }
  0xfe   :  { %523 = vrot.lane.b32.xlu1 %v521_v53, %s2471_s1 }
 0x102   :  { %60 = vperm.xlu1 %2368, %v33_v54  }
 0x106   :  { %2369 = vset.pattern.permute.xlu1 %v2467_v9 }
 0x107   :  { %231 = vperm.xlu1 %2369, %v33_v54  }
 0x10b   :  { %2372 = vset.pattern.permute.xlu1 %v2468_v27 }
 0x170   :  { %v524_v57 = vpop.permute.xlu1 %523 }
 0x171   :  { %v526_v58 = vadd.f32 %v524_v57, %v520_v56 }
 0x173   :  { %2405 = vtanh.f32 %v526_v58 }
 0x17d   :  { %v2406_v59 = vpop.eup %2405 }
 0x17e   :  { %v528_v61 = vmul.f32 %v2406_v59, %v519_v52 }
 0x180   :  { %532 = vrot.lane.b32.xlu0 %v528_v61, %s2471_s1 }
 0x181   :  { %v61_v63 = vpop.permute.xlu1 %60 }
 0x182   :  { %v114_v1 = vmul.f32 %v2643_v41, %v61_v63  ;;  %v115_v2 = vmul.f32 %v2647_v44, %v61_v63 }
 0x184   :  { %149 = vperm.xlu0 %2365, %v33_v54   ;;  %v130_v8 = vadd.f32 %v114_v1, %v2650_v47  ;;  %v131_v14 = vadd.f32 %v115_v2, %v2653_v48  ;;  %v34_v2 = vld [vmem:[%s3088_s0 + $0x10] sm:$0xff] }
 0x186   :  { %v232_v19 = vpop.permute.xlu1 %231 }
 0x187   :  { %v278_v21 = vmul.f32 %v2664_v60, %v232_v19  ;;  %v279_v25 = vmul.f32 %v2668_v0, %v232_v19 }
 0x188   :  { %2370 = vset.pattern.permute.xlu0 %v2469_v28 }
 0x189   :  { %313 = vperm.xlu0 %2370, %v33_v54  }
 0x18d   :  { %2371 = vset.pattern.permute.xlu0 %v2466_v4 }
 0x18e   :  { %65 = vperm.xlu0 %2371, %v34_v2  }
 0x192   :  { %2374 = vset.pattern.permute.xlu0 %v2469_v28 }
 0x193   :  { %317 = vperm.xlu0 %2374, %v34_v2  }
 0x197   :  { %2375 = vset.pattern.permute.xlu0 %v2466_v4 }
 0x1f2   :  { %v533_v62 = vpop.permute.xlu0 %532 }
 0x1f3   :  { %2025 = vmatmul.mubr.msk.f32.vlgmr.msra.gmra.mrb[0].mxu1 %vm437_vm1, %v533_v62 }
 0x1f4   :  { %2225 = vmatpush1.bf16.msra.mxu1 %v2553_v10  ;;  %790 = vmatprep.mubr.f32.mxu1 %v2465_v3 }
 0x1f5   :  { %2227 = vmatprep.subr.bf16.mxu1 %v2555_v11 }
 0x1f8   :  { %2229 = vmatpush1.bf16.msra.mxu1 %v2572_v16 }
 0x1f9   :  { %2231 = vmatprep.subr.bf16.mxu1 %v2576_v17 }
 0x1fc   :  { %2233 = vmatpush1.bf16.msra.mxu1 %v2595_v23 }
 0x1fd   :  { %2235 = vmatprep.subr.bf16.mxu1 %v2599_v24 }
 0x200   :  { %2237 = vmatpush1.bf16.msra.mxu1 %v2611_v29 }
 0x201   :  { %2255 = vmatprep.subr.bf16.mxu1 %v2540_v5 }
 0x203   :  { %v150_v7 = vpop.permute.xlu0 %149 }
 0x204   :  { %v196_v13 = vmul.f32 %v2657_v51, %v150_v7  ;;  %v197_v18 = vmul.f32 %v2661_v55, %v150_v7 }
 0x206   :  { %v212_v20 = vadd.f32 %v196_v13, %v130_v8  ;;  %v213_v22 = vadd.f32 %v197_v18, %v131_v14 }
 0x208   :  { %v314_v26 = vpop.permute.xlu0 %313  ;;  %v294_v30 = vadd.f32 %v278_v21, %v212_v20  ;;  %v295_v33 = vadd.f32 %v279_v25, %v213_v22 }
 0x209   :  { %v360_v31 = vmul.f32 %v2674_v12, %v314_v26  ;;  %v361_v37 = vmul.f32 %v2677_v15, %v314_v26 }
 0x20b   :  { %v376_v38 = vadd.f32 %v360_v31, %v294_v30  ;;  %v377_v40 = vadd.f32 %v361_v37, %v295_v33 }
 0x20d   :  { %v66_v13 = vpop.permute.xlu0 %65 }
 0x20e   :  { %v116_v18 = vmul.f32 %v2643_v41, %v66_v13  ;;  %v117_v19 = vmul.f32 %v2647_v44, %v66_v13 }
 0x210   :  { %v132_v21 = vadd.f32 %v116_v18, %v2650_v47  ;;  %v133_v25 = vadd.f32 %v117_v19, %v2653_v48  ;;  %v35_v18 = vld [vmem:[%s3088_s0 + $0x18] sm:$0xff] }
 0x211   :  { %70 = vperm.xlu0 %2375, %v35_v18  }
 0x215   :  { %2378 = vset.pattern.permute.xlu0 %v2469_v28 }
 0x216   :  { %321 = vperm.xlu0 %2378, %v35_v18  }
 0x21a   :  { %2379 = vset.pattern.permute.xlu0 %v2466_v4 }
 0x2c6   :  { %v602_v39 = vpop.f32.mrb[0].mxu1 }
 0x2c7   :  { %v603_v42 = vadd.f32 %v602_v39, %v376_v38  ;;  %v604_v43 = vpop.f32.mrb[1].mxu1  ;;  %v318_v38 = vpop.permute.xlu0 %317 }
 0x2c8   :  { %v605_v45 = vadd.f32 %v604_v43, %v377_v40  ;;  %v362_v40 = vmul.f32 %v2674_v12, %v318_v38  ;;  %v363_v43 = vmul.f32 %v2677_v15, %v318_v38 }
 0x2c9   :  { %v607_v49 = vmul.f32 0.5, %v603_v42 }
 0x2ca   :  { %v608_v50 = vmul.f32 %v605_v45, %v2684_v36 }
 0x2cb   :  { %2407 = vtanh.f32 %v607_v49 }
 0x2cc   :  { %2409 = vtanh.f32 %v608_v50 }
 0x2d5   :  { %v2408_v52 = vpop.eup %2407 }
 0x2d6   :  { %v2410_v53 = vpop.eup %2409  ;;  %v611_v54 = vmul.f32 0.5, %v2408_v52 }
 0x2d7   :  { %v612_v56 = vmul.f32 %v2410_v53, %v2684_v36 }
 0x2d8   :  { %v613_v57 = vadd.f32 0.5, %v611_v54 }
 0x2d9   :  { %v614_v59 = vadd.f32 %v612_v56, %v2689_v46 }
 0x2da   :  { %v615_v62 = vmul.f32 %v613_v57, %v526_v58 }
 0x2db   :  { %v616_v61 = vmul.f32 %v614_v59, %v613_v57 }
 0x2dd   :  { %618 = vrot.lane.b32.xlu1 %v616_v61, %s2471_s1 }
 0x34f   :  { %v619_v63 = vpop.permute.xlu1 %618 }
 0x350   :  { %v621_v1 = vadd.f32 %v619_v63, %v615_v62 }
 0x352   :  { %2411 = vtanh.f32 %v621_v1 }
 0x35c   :  { %v2412_v7 = vpop.eup %2411 }
 0x35d   :  { %v623_v8 = vmul.f32 %v2412_v7, %v614_v59 }
 0x35f   :  { %627 = vrot.lane.b32.xlu1 %v623_v8, %s2471_s1 }
 0x363   :  { %153 = vperm.xlu1 %2372, %v34_v2  }
 0x367   :  { %2373 = vset.pattern.permute.xlu1 %v2467_v9 }
 0x368   :  { %235 = vperm.xlu1 %2373, %v34_v2  }
 0x36c   :  { %2376 = vset.pattern.permute.xlu1 %v2468_v27 }
 0x3d1   :  { %v628_v58 = vpop.permute.xlu1 %627 }
 0x3d2   :  { %2026 = vmatmul.mubr.msk.f32.vlgmr.msra.gmra.mrb[2].mxu0 %vm437_vm1, %v628_v58 }
 0x3d3   :  { %2241 = vmatpush1.bf16.msra.mxu0 %v2553_v10  ;;  %885 = vmatprep.mubr.f32.mxu0 %v2465_v3 }
 0x3d4   :  { %2243 = vmatprep.subr.bf16.mxu0 %v2555_v11 }
 0x3d7   :  { %2245 = vmatpush1.bf16.msra.mxu0 %v2572_v16 }
 0x3d8   :  { %2247 = vmatprep.subr.bf16.mxu0 %v2576_v17 }
 0x3db   :  { %2249 = vmatpush1.bf16.msra.mxu0 %v2595_v23 }
 0x3dc   :  { %2251 = vmatprep.subr.bf16.mxu0 %v2599_v24 }
 0x3df   :  { %2253 = vmatpush1.bf16.msra.mxu0 %v2611_v29 }
 0x3e0   :  { %2271 = vmatprep.subr.bf16.mxu0 %v2540_v5 }
 0x3e2   :  { %v154_v14 = vpop.permute.xlu1 %153 }
 0x3e3   :  { %v198_v20 = vmul.f32 %v2657_v51, %v154_v14  ;;  %v199_v22 = vmul.f32 %v2661_v55, %v154_v14 }
 0x3e5   :  { %v214_v30 = vadd.f32 %v198_v20, %v132_v21  ;;  %v215_v33 = vadd.f32 %v199_v22, %v133_v25  ;;  %v71_v21 = vpop.permute.xlu0 %70 }
 0x3e6   :  { %v118_v25 = vmul.f32 %v2643_v41, %v71_v21 }
 0x3e7   :  { %v236_v26 = vpop.permute.xlu1 %235 }
 0x3e8   :  { %v280_v31 = vmul.f32 %v2664_v60, %v236_v26  ;;  %v281_v37 = vmul.f32 %v2668_v0, %v236_v26  ;;  %v119_v26 = vmul.f32 %v2647_v44, %v71_v21 }
 0x3ea   :  { %v296_v39 = vadd.f32 %v280_v31, %v214_v30  ;;  %v297_v42 = vadd.f32 %v281_v37, %v215_v33  ;;  %v134_v31 = vadd.f32 %v118_v25, %v2650_v47  ;;  %v135_v37 = vadd.f32 %v119_v26, %v2653_v48 }
 0x3ec   :  { %v378_v45 = vadd.f32 %v362_v40, %v296_v39  ;;  %v379_v50 = vadd.f32 %v363_v43, %v297_v42  ;;  %v322_v43 = vpop.permute.xlu0 %321 }
 0x4a5   :  { %v697_v49 = vpop.f32.mrb[2].mxu0 }
 0x4a6   :  { %v698_v52 = vadd.f32 %v697_v49, %v378_v45  ;;  %v699_v53 = vpop.f32.mrb[3].mxu0  ;;  %v364_v49 = vmul.f32 %v2674_v12, %v322_v43 }
 0x4a7   :  { %v700_v54 = vadd.f32 %v699_v53, %v379_v50 }
 0x4a8   :  { %v702_v56 = vmul.f32 0.5, %v698_v52  ;;  %v365_v52 = vmul.f32 %v2677_v15, %v322_v43 }
 0x4a9   :  { %v703_v57 = vmul.f32 %v700_v54, %v2684_v36 }
 0x4aa   :  { %2413 = vtanh.f32 %v702_v56 }
 0x4ab   :  { %2415 = vtanh.f32 %v703_v57 }
 0x4b4   :  { %v2414_v59 = vpop.eup %2413 }
 0x4b5   :  { %v2416_v61 = vpop.eup %2415  ;;  %v706_v62 = vmul.f32 0.5, %v2414_v59 }
 0x4b6   :  { %v707_v63 = vmul.f32 %v2416_v61, %v2684_v36 }
 0x4b7   :  { %v708_v2 = vadd.f32 0.5, %v706_v62 }
 0x4b8   :  { %v709_v7 = vadd.f32 %v707_v63, %v2689_v46 }
 0x4b9   :  { %v710_v58 = vmul.f32 %v708_v2, %v621_v1 }
 0x4ba   :  { %v711_v8 = vmul.f32 %v709_v7, %v708_v2 }
 0x4bc   :  { %713 = vrot.lane.b32.xlu1 %v711_v8, %s2471_s1 }
 0x52e   :  { %v714_v13 = vpop.permute.xlu1 %713 }
 0x52f   :  { %v716_v14 = vadd.f32 %v714_v13, %v710_v58 }
 0x531   :  { %2417 = vtanh.f32 %v716_v14 }
 0x53b   :  { %v2418_v19 = vpop.eup %2417 }
 0x53c   :  { %v718_v20 = vmul.f32 %v2418_v19, %v709_v7 }
 0x53e   :  { %722 = vrot.lane.b32.xlu1 %v718_v20, %s2471_s1 }
 0x542   :  { %157 = vperm.xlu1 %2376, %v35_v18  }
 0x546   :  { %2377 = vset.pattern.permute.xlu1 %v2467_v9 }
 0x547   :  { %239 = vperm.xlu1 %2377, %v35_v18  }
 0x54b   :  { %2380 = vset.pattern.permute.xlu1 %v2468_v27 }
 0x5b0   :  { %v723_v1 = vpop.permute.xlu1 %722 }
 0x5b1   :  { %2027 = vmatmul.mubr.msk.f32.vlgmr.msra.gmra.mrb[2].mxu1 %vm437_vm1, %v723_v1 }
 0x5b2   :  { %2257 = vmatpush1.bf16.msra.mxu1 %v2553_v10  ;;  %980 = vmatprep.mubr.f32.mxu1 %v2465_v3 }
 0x5b3   :  { %2259 = vmatprep.subr.bf16.mxu1 %v2555_v11 }
 0x5b6   :  { %2261 = vmatpush1.bf16.msra.mxu1 %v2572_v16 }
 0x5b7   :  { %2263 = vmatprep.subr.bf16.mxu1 %v2576_v17 }
 0x5ba   :  { %2265 = vmatpush1.bf16.msra.mxu1 %v2595_v23 }
 0x5bb   :  { %2267 = vmatprep.subr.bf16.mxu1 %v2599_v24 }
 0x5be   :  { %2269 = vmatpush1.bf16.msra.mxu1 %v2611_v29 }
 0x5bf   :  { %2287 = vmatprep.subr.bf16.mxu1 %v2540_v5 }
 0x5c1   :  { %v158_v22 = vpop.permute.xlu1 %157 }
 0x5c2   :  { %v200_v30 = vmul.f32 %v2657_v51, %v158_v22  ;;  %v201_v33 = vmul.f32 %v2661_v55, %v158_v22  ;;  %v36_v22 = vld [vmem:[%s3088_s0 + $0x20] sm:$0xff] }
 0x5c3   :  { %75 = vperm.xlu0 %2379, %v36_v22  }
 0x5c4   :  { %v216_v39 = vadd.f32 %v200_v30, %v134_v31  ;;  %v217_v42 = vadd.f32 %v201_v33, %v135_v37 }
 0x5c6   :  { %v240_v38 = vpop.permute.xlu1 %239 }
 0x5c7   :  { %v282_v40 = vmul.f32 %v2664_v60, %v240_v38  ;;  %v283_v5 = vmul.f32 %v2668_v0, %v240_v38  ;;  %2382 = vset.pattern.permute.xlu0 %v2469_v28 }
 0x5c8   :  { %325 = vperm.xlu0 %2382, %v36_v22  }
 0x5c9   :  { %v298_v45 = vadd.f32 %v282_v40, %v216_v39  ;;  %v299_v50 = vadd.f32 %v283_v5, %v217_v42 }
 0x5cb   :  { %v380_v53 = vadd.f32 %v364_v49, %v298_v45  ;;  %v381_v56 = vadd.f32 %v365_v52, %v299_v50 }
 0x5cc   :  { %2383 = vset.pattern.permute.xlu0 %v2466_v4 }
 0x642   :  { %v76_v30 = vpop.permute.xlu0 %75 }
 0x643   :  { %v120_v33 = vmul.f32 %v2643_v41, %v76_v30  ;;  %v121_v37 = vmul.f32 %v2647_v44, %v76_v30 }
 0x645   :  { %v136_v39 = vadd.f32 %v120_v33, %v2650_v47  ;;  %v137_v42 = vadd.f32 %v121_v37, %v2653_v48 }
 0x647   :  { %v326_v52 = vpop.permute.xlu0 %325 }
 0x684   :  { %v792_v54 = vpop.f32.mrb[2].mxu1 }
 0x685   :  { %v793_v57 = vadd.f32 %v792_v54, %v380_v53  ;;  %v794_v59 = vpop.f32.mrb[3].mxu1  ;;  %v366_v54 = vmul.f32 %v2674_v12, %v326_v52 }
 0x686   :  { %v795_v61 = vadd.f32 %v794_v59, %v381_v56 }
 0x687   :  { %v797_v62 = vmul.f32 0.5, %v793_v57  ;;  %v367_v57 = vmul.f32 %v2677_v15, %v326_v52 }
 0x688   :  { %v798_v63 = vmul.f32 %v795_v61, %v2684_v36 }
 0x689   :  { %2419 = vtanh.f32 %v797_v62 }
 0x68a   :  { %2421 = vtanh.f32 %v798_v63 }
 0x693   :  { %v2420_v2 = vpop.eup %2419 }
 0x694   :  { %v2422_v7 = vpop.eup %2421  ;;  %v801_v8 = vmul.f32 0.5, %v2420_v2 }
 0x695   :  { %v802_v58 = vmul.f32 %v2422_v7, %v2684_v36 }
 0x696   :  { %v803_v13 = vadd.f32 0.5, %v801_v8 }
 0x697   :  { %v804_v18 = vadd.f32 %v802_v58, %v2689_v46 }
 0x698   :  { %v805_v20 = vmul.f32 %v803_v13, %v716_v14 }
 0x699   :  { %v806_v19 = vmul.f32 %v804_v18, %v803_v13 }
 0x69b   :  { %808 = vrot.lane.b32.xlu1 %v806_v19, %s2471_s1 }
 0x70d   :  { %v809_v1 = vpop.permute.xlu1 %808 }
 0x70e   :  { %v811_v21 = vadd.f32 %v809_v1, %v805_v20 }
 0x710   :  { %2423 = vtanh.f32 %v811_v21 }
 0x71a   :  { %v2424_v25 = vpop.eup %2423 }
 0x71b   :  { %v813_v26 = vmul.f32 %v2424_v25, %v804_v18 }
 0x71d   :  { %817 = vrot.lane.b32.xlu1 %v813_v26, %s2471_s1 }
 0x721   :  { %161 = vperm.xlu1 %2380, %v36_v22  }
 0x725   :  { %2381 = vset.pattern.permute.xlu1 %v2467_v9 }
 0x726   :  { %243 = vperm.xlu1 %2381, %v36_v22  }
 0x72a   :  { %2384 = vset.pattern.permute.xlu1 %v2468_v27 }
 0x78f   :  { %v818_v14 = vpop.permute.xlu1 %817 }
 0x790   :  { %2028 = vmatmul.mubr.msk.f32.vlgmr.msra.gmra.mrb[4].mxu0 %vm437_vm1, %v818_v14 }
 0x791   :  { %2273 = vmatpush1.bf16.msra.mxu0 %v2553_v10  ;;  %1075 = vmatprep.mubr.f32.mxu0 %v2465_v3 }
 0x792   :  { %2275 = vmatprep.subr.bf16.mxu0 %v2555_v11 }
 0x795   :  { %2277 = vmatpush1.bf16.msra.mxu0 %v2572_v16 }
 0x796   :  { %2279 = vmatprep.subr.bf16.mxu0 %v2576_v17 }
 0x799   :  { %2281 = vmatpush1.bf16.msra.mxu0 %v2595_v23 }
 0x79a   :  { %2283 = vmatprep.subr.bf16.mxu0 %v2599_v24 }
 0x79d   :  { %2285 = vmatpush1.bf16.msra.mxu0 %v2611_v29 }
 0x7a0   :  { %v162_v31 = vpop.permute.xlu1 %161 }
 0x7a1   :  { %v202_v38 = vmul.f32 %v2657_v51, %v162_v31  ;;  %v203_v40 = vmul.f32 %v2661_v55, %v162_v31  ;;  %v37_v31 = vld [vmem:[%s3088_s0 + $0x28] sm:$0xff] }
 0x7a2   :  { %80 = vperm.xlu0 %2383, %v37_v31  }
 0x7a3   :  { %v218_v43 = vadd.f32 %v202_v38, %v136_v39  ;;  %v219_v49 = vadd.f32 %v203_v40, %v137_v42 }
 0x7a5   :  { %v244_v5 = vpop.permute.xlu1 %243 }
 0x7a6   :  { %v284_v45 = vmul.f32 %v2664_v60, %v244_v5  ;;  %v285_v50 = vmul.f32 %v2668_v0, %v244_v5  ;;  %2386 = vset.pattern.permute.xlu0 %v2469_v28 }
 0x7a7   :  { %329 = vperm.xlu0 %2386, %v37_v31  }
 0x7a8   :  { %v300_v53 = vadd.f32 %v284_v45, %v218_v43  ;;  %v301_v56 = vadd.f32 %v285_v50, %v219_v49 }
 0x7aa   :  { %v382_v59 = vadd.f32 %v366_v54, %v300_v53  ;;  %v383_v62 = vadd.f32 %v367_v57, %v301_v56 }
 0x7ab   :  { %2387 = vset.pattern.permute.xlu0 %v2466_v4 }
 0x821   :  { %v81_v38 = vpop.permute.xlu0 %80 }
 0x822   :  { %v122_v40 = vmul.f32 %v2643_v41, %v81_v38 }
 0x826   :  { %v330_v45 = vpop.permute.xlu0 %329 }
 0x827   :  { %v368_v50 = vmul.f32 %v2674_v12, %v330_v45  ;;  %v369_v53 = vmul.f32 %v2677_v15, %v330_v45 }
 0x863   :  { %v887_v61 = vpop.f32.mrb[4].mxu0 }
 0x864   :  { %v888_v63 = vadd.f32 %v887_v61, %v382_v59  ;;  %v889_v2 = vpop.f32.mrb[5].mxu0 }
 0x865   :  { %v890_v7 = vadd.f32 %v889_v2, %v383_v62 }
 0x866   :  { %v892_v8 = vmul.f32 0.5, %v888_v63 }
 0x867   :  { %v893_v58 = vmul.f32 %v890_v7, %v2684_v36 }
 0x868   :  { %2425 = vtanh.f32 %v892_v8 }
 0x869   :  { %2427 = vtanh.f32 %v893_v58 }
 0x872   :  { %v2426_v13 = vpop.eup %2425 }
 0x873   :  { %v2428_v18 = vpop.eup %2427  ;;  %v896_v19 = vmul.f32 0.5, %v2426_v13 }
 0x874   :  { %v897_v20 = vmul.f32 %v2428_v18, %v2684_v36 }
 0x875   :  { %v898_v1 = vadd.f32 0.5, %v896_v19 }
 0x876   :  { %v899_v22 = vadd.f32 %v897_v20, %v2689_v46 }
 0x877   :  { %v900_v26 = vmul.f32 %v898_v1, %v811_v21 }
 0x878   :  { %v901_v25 = vmul.f32 %v899_v22, %v898_v1 }
 0x87a   :  { %903 = vrot.lane.b32.xlu1 %v901_v25, %s2471_s1 }
 0x8ec   :  { %v904_v14 = vpop.permute.xlu1 %903 }
 0x8ed   :  { %v906_v30 = vadd.f32 %v904_v14, %v900_v26  ;;  %v38_v26 = vld [vmem:[%s3088_s0 + $0x30] sm:$0xff] }
 0x8ee   :  { %85 = vperm.xlu0 %2387, %v38_v26  }
 0x8ef   :  { %2429 = vtanh.f32 %v906_v30 }
 0x8f2   :  { %2390 = vset.pattern.permute.xlu0 %v2469_v28 }
 0x8f3   :  { %333 = vperm.xlu0 %2390, %v38_v26  }
 0x8f7   :  { %2391 = vset.pattern.permute.xlu0 %v2466_v4 }
 0x8f9   :  { %v2430_v33 = vpop.eup %2429 }
 0x8fa   :  { %v908_v37 = vmul.f32 %v2430_v33, %v899_v22 }
 0x8fc   :  { %912 = vrot.lane.b32.xlu1 %v908_v37, %s2471_s1 }
 0x900   :  { %165 = vperm.xlu1 %2384, %v37_v31  }
 0x904   :  { %2385 = vset.pattern.permute.xlu1 %v2467_v9 }
 0x905   :  { %247 = vperm.xlu1 %2385, %v37_v31  }
 0x909   :  { %2388 = vset.pattern.permute.xlu1 %v2468_v27 }
 0x96d   :  { %v86_v33 = vpop.permute.xlu0 %85 }
 0x96e   :  { %v913_v21 = vpop.permute.xlu1 %912 }
 0x96f   :  { %2029 = vmatmul.mubr.msk.f32.vlgmr.msra.gmra.mrb[4].mxu1 %vm437_vm1, %v913_v21  ;;  %v124_v21 = vmul.f32 %v2643_v41, %v86_v33 }
 0x970   :  { %2289 = vmatpush1.bf16.msra.mxu1 %v2553_v10  ;;  %1170 = vmatprep.mubr.f32.mxu1 %v2465_v3  ;;  %v123_v10 = vmul.f32 %v2647_v44, %v81_v38  ;;  %v125_v38 = vmul.f32 %v2647_v44, %v86_v33 }
 0x971   :  { %2291 = vmatprep.subr.bf16.mxu1 %v2555_v11  ;;  %v138_v11 = vadd.f32 %v122_v40, %v2650_v47  ;;  %v140_v40 = vadd.f32 %v124_v21, %v2650_v47 }
 0x974   :  { %2293 = vmatpush1.bf16.msra.mxu1 %v2572_v16 }
 0x975   :  { %2295 = vmatprep.subr.bf16.mxu1 %v2576_v17  ;;  %v139_v17 = vadd.f32 %v123_v10, %v2653_v48 }
 0x978   :  { %2297 = vmatpush1.bf16.msra.mxu1 %v2595_v23 }
 0x979   :  { %2299 = vmatprep.subr.bf16.mxu1 %v2599_v24 }
 0x97c   :  { %2301 = vmatpush1.bf16.msra.mxu1 %v2611_v29 }
 0x97f   :  { %v166_v39 = vpop.permute.xlu1 %165 }
 0x980   :  { %v204_v42 = vmul.f32 %v2657_v51, %v166_v39  ;;  %v205_v16 = vmul.f32 %v2661_v55, %v166_v39 }
 0x982   :  { %v220_v23 = vadd.f32 %v204_v42, %v138_v11  ;;  %v221_v43 = vadd.f32 %v205_v16, %v139_v17  ;;  %v141_v42 = vadd.f32 %v125_v38, %v2653_v48 }
 0x984   :  { %v248_v5 = vpop.permute.xlu1 %247 }
 0x985   :  { %v286_v24 = vmul.f32 %v2664_v60, %v248_v5  ;;  %v287_v29 = vmul.f32 %v2668_v0, %v248_v5 }
 0x987   :  { %v302_v49 = vadd.f32 %v286_v24, %v220_v23  ;;  %v303_v52 = vadd.f32 %v287_v29, %v221_v43  ;;  %v334_v24 = vpop.permute.xlu0 %333 }
 0x988   :  { %v370_v29 = vmul.f32 %v2674_v12, %v334_v24 }
 0x989   :  { %v384_v54 = vadd.f32 %v368_v50, %v302_v49  ;;  %v385_v57 = vadd.f32 %v369_v53, %v303_v52  ;;  %v371_v49 = vmul.f32 %v2677_v15, %v334_v24 }
 0xa42   :  { %v982_v56 = vpop.f32.mrb[4].mxu1 }
 0xa43   :  { %v983_v59 = vadd.f32 %v982_v56, %v384_v54  ;;  %v984_v61 = vpop.f32.mrb[5].mxu1 }
 0xa44   :  { %v985_v62 = vadd.f32 %v984_v61, %v385_v57 }
 0xa45   :  { %v987_v63 = vmul.f32 0.5, %v983_v59 }
 0xa46   :  { %v988_v2 = vmul.f32 %v985_v62, %v2684_v36 }
 0xa47   :  { %2431 = vtanh.f32 %v987_v63 }
 0xa48   :  { %2433 = vtanh.f32 %v988_v2 }
 0xa51   :  { %v2432_v7 = vpop.eup %2431 }
 0xa52   :  { %v2434_v8 = vpop.eup %2433  ;;  %v991_v58 = vmul.f32 0.5, %v2432_v7 }
 0xa53   :  { %v992_v13 = vmul.f32 %v2434_v8, %v2684_v36 }
 0xa54   :  { %v993_v18 = vadd.f32 0.5, %v991_v58 }
 0xa55   :  { %v994_v19 = vadd.f32 %v992_v13, %v2689_v46 }
 0xa56   :  { %v995_v1 = vmul.f32 %v993_v18, %v906_v30 }
 0xa57   :  { %v996_v20 = vmul.f32 %v994_v19, %v993_v18 }
 0xa59   :  { %998 = vrot.lane.b32.xlu1 %v996_v20, %s2471_s1 }
 0xacb   :  { %v999_v22 = vpop.permute.xlu1 %998 }
 0xacc   :  { %v1001_v25 = vadd.f32 %v999_v22, %v995_v1  ;;  %v2878_v1 = vld [vmem:[%s3088_s0 + $0x38] sm:$0xff]  ;;  %s2472_s0 = smov 96  }
 0xacd   :  { %90 = vperm.xlu0 %2391, %v2878_v1  }
 0xace   :  { %2435 = vtanh.f32 %v1001_v25 }
 0xad1   :  { %2394 = vset.pattern.permute.xlu0 %v2469_v28 }
 0xad2   :  { %337 = vperm.xlu0 %2394, %v2878_v1  }
 0xad8   :  { %v2436_v14 = vpop.eup %2435 }
 0xad9   :  { %v1003_v31 = vmul.f32 %v2436_v14, %v994_v19 }
 0xadb   :  { %1007 = vrot.lane.b32.xlu1 %v1003_v31, %s2471_s1 }
 0xadf   :  { %169 = vperm.xlu1 %2388, %v38_v26  }
 0xae3   :  { %2389 = vset.pattern.permute.xlu1 %v2467_v9 }
 0xae4   :  { %251 = vperm.xlu1 %2389, %v38_v26  }
 0xae8   :  { %2392 = vset.pattern.permute.xlu1 %v2468_v27 }
 0xb4c   :  { %v91_v14 = vpop.permute.xlu0 %90 }
 0xb4d   :  { %v1008_v30 = vpop.permute.xlu1 %1007  ;;  %v127_v28 = vmul.f32 %v2647_v44, %v91_v14 }
 0xb4e   :  { %2030 = vmatmul.mubr.msk.f32.vlgmr.msra.gmra.mrb[6].mxu0 %vm437_vm1, %v1008_v30  ;;  %v126_v30 = vmul.f32 %v2643_v41, %v91_v14 }
 0xb4f   :  { %v143_v38 = vadd.f32 %v127_v28, %v2653_v48  ;;  %2094 = vmatprep.mubr.msk.f32.mxu0 %vm2474_vm2, %v2465_v3 }
 0xb5e   :  { %v170_v37 = vpop.permute.xlu1 %169 }
 0xb5f   :  { %v206_v39 = vmul.f32 %v2657_v51, %v170_v37  ;;  %v207_v10 = vmul.f32 %v2661_v55, %v170_v37  ;;  %v142_v37 = vadd.f32 %v126_v30, %v2650_v47 }
 0xb61   :  { %v222_v16 = vadd.f32 %v206_v39, %v140_v40  ;;  %v223_v5 = vadd.f32 %v207_v10, %v141_v42 }
 0xb63   :  { %v252_v11 = vpop.permute.xlu1 %251 }
 0xb64   :  { %v288_v17 = vmul.f32 %v2664_v60, %v252_v11  ;;  %v289_v23 = vmul.f32 %v2668_v0, %v252_v11  ;;  %v338_v11 = vpop.permute.xlu0 %337 }
 0xb65   :  { %v372_v41 = vmul.f32 %v2674_v12, %v338_v11 }
 0xb66   :  { %v304_v43 = vadd.f32 %v288_v17, %v222_v16  ;;  %v305_v45 = vadd.f32 %v289_v23, %v223_v5 }
 0xb68   :  { %v386_v50 = vadd.f32 %v370_v29, %v304_v43  ;;  %v387_v53 = vadd.f32 %v371_v49, %v305_v45 }
 0xc21   :  { %v1077_v52 = vpop.f32.mrb[6].mxu0 }
 0xc22   :  { %v1078_v54 = vadd.f32 %v1077_v52, %v386_v50  ;;  %v1079_v56 = vpop.f32.mrb[7].mxu0 }
 0xc23   :  { %v1080_v57 = vadd.f32 %v1079_v56, %v387_v53 }
 0xc24   :  { %v1082_v59 = vmul.f32 0.5, %v1078_v54 }
 0xc25   :  { %v1083_v61 = vmul.f32 %v1080_v57, %v2684_v36  ;;  %v1246_v57 = vld [vmem:[%s3091_s5 + $0x8] sm:$0xff] }
 0xc26   :  { %2437 = vtanh.f32 %v1082_v59  ;;  %v1247_v59 = vld [vmem:[%s3091_s5 + $0x10] sm:$0xff] }
 0xc27   :  { %2439 = vtanh.f32 %v1083_v61 }
 0xc30   :  { %v2438_v62 = vpop.eup %2437 }
 0xc31   :  { %v2440_v63 = vpop.eup %2439  ;;  %v1086_v2 = vmul.f32 0.5, %v2438_v62  ;;  %v1248_v62 = vld [vmem:[%s3091_s5 + $0x18] sm:$0xff] }
 0xc32   :  { %v1087_v7 = vmul.f32 %v2440_v63, %v2684_v36  ;;  %v2925_v63 = vpack.c.bf16 %v1248_v62, %v1247_v59 }
 0xc33   :  { %v1088_v8 = vadd.f32 0.5, %v1086_v2 }
 0xc34   :  { %v1089_v58 = vadd.f32 %v1087_v7, %v2689_v46 }
 0xc35   :  { %v1090_v18 = vmul.f32 %v1088_v8, %v1001_v25 }
 0xc36   :  { %v1091_v13 = vmul.f32 %v1089_v58, %v1088_v8 }
 0xc38   :  { %1093 = vrot.lane.b32.xlu1 %v1091_v13, %s2471_s1 }
 0xcaa   :  { %v1094_v19 = vpop.permute.xlu1 %1093 }
 0xcab   :  { %v1096_v20 = vadd.f32 %v1094_v19, %v1090_v18  ;;  %v1204_v19 = vld [vmem:[%s3092_s4] sm:$0x3]  ;;  %s2475_s4 = smov 32  }
 0xcad   :  { %2441 = vtanh.f32 %v1096_v20 }
 0xcb7   :  { %v2442_v22 = vpop.eup %2441 }
 0xcb8   :  { %v1098_v26 = vmul.f32 %v2442_v22, %v1089_v58  ;;  %v2947_v22 = vrot.slane %v1204_v19, %v2631_v32  ;;  %v2959_v32 = vsel %vm1229_vm6, 1.0, %v2470_v34 }
 0xcba   :  { %1102 = vrot.lane.b32.xlu1 %v1098_v26, %s2471_s1 }
 0xcbe   :  { %173 = vperm.xlu1 %2392, %v2878_v1  }
 0xcc2   :  { %2393 = vset.pattern.permute.xlu1 %v2467_v9 }
 0xcc3   :  { %255 = vperm.xlu1 %2393, %v2878_v1  }
 0xd2c   :  { %v1103_v25 = vpop.permute.xlu1 %1102 }
 0xd2d   :  { %2031 = vmatmul.mubr.msk.f32.vlgmr.msra.gmra.mrb[6].mxu1 %vm437_vm1, %v1103_v25 }
 0xd2e   :  { %2105 = vmatprep.mubr.msk.f32.mxu1 %vm2474_vm2, %v2465_v3 }
 0xd3d   :  { %v174_v31 = vpop.permute.xlu1 %173 }
 0xd3e   :  { %v208_v33 = vmul.f32 %v2657_v51, %v174_v31  ;;  %v209_v21 = vmul.f32 %v2661_v55, %v174_v31  ;;  %v373_v51 = vmul.f32 %v2677_v15, %v338_v11  ;;  %v2956_v31 = vld [vmem:[%s3093_s6] ss:$0 sm:$0xff] }
 0xd40   :  { %v224_v39 = vadd.f32 %v208_v33, %v142_v37  ;;  %v225_v10 = vadd.f32 %v209_v21, %v143_v38  ;;  %v2964_v21 = vsel %vm1229_vm6, 0.0, %v2470_v34  ;;  %v1352_v34 = vld [vmem:[%s3094_s7] sm:$0xff] }
 0xd42   :  { %v256_v9 = vpop.permute.xlu1 %255 }
 0xd43   :  { %v290_v40 = vmul.f32 %v2664_v60, %v256_v9  ;;  %v291_v42 = vmul.f32 %v2668_v0, %v256_v9 }
 0xd45   :  { %v306_v16 = vadd.f32 %v290_v40, %v224_v39  ;;  %v307_v44 = vadd.f32 %v291_v42, %v225_v10 }
 0xd47   :  { %v388_v17 = vadd.f32 %v372_v41, %v306_v16  ;;  %v389_v5 = vadd.f32 %v373_v51, %v307_v44  ;;  %v1353_v41 = vld [vmem:[%s3094_s7 + $0x8] sm:$0xff]  ;;  %v1354_v44 = vld [vmem:[%s3094_s7 + $0x10] sm:$0xff] }
 0xd48   :  { %v2979_v51 = vpack.c.bf16 %v1353_v41, %v1352_v34 }
 0xe00   :  { %v1172_v47 = vpop.f32.mrb[6].mxu1 }
 0xe01   :  { %v1173_v55 = vadd.f32 %v1172_v47, %v388_v17  ;;  %v1174_v23 = vpop.f32.mrb[7].mxu1  ;;  %v1355_v17 = vld [vmem:[%s3094_s7 + $0x18] sm:$0xff] }
 0xe02   :  { %v1175_v48 = vadd.f32 %v1174_v23, %v389_v5  ;;  %v2985_v47 = vpack.c.bf16 %v1355_v17, %v1354_v44 }
 0xe03   :  { %v1177_v24 = vmul.f32 0.5, %v1173_v55 }
 0xe04   :  { %v1178_v43 = vmul.f32 %v1175_v48, %v2684_v36 }
 0xe05   :  { %2443 = vtanh.f32 %v1177_v24  ;;  %v3009_v24 = vld [vmem:[%s3095_s8] ss:$0 sm:$0xff]  ;;  %s2476_s8 = smov 2  }
 0xe06   :  { %2445 = vtanh.f32 %v1178_v43 }
 0xe0f   :  { %v2444_v60 = vpop.eup %2443 }
 0xe10   :  { %v2446_v0 = vpop.eup %2445  ;;  %v1181_v29 = vmul.f32 0.5, %v2444_v60 }
 0xe11   :  { %v1182_v45 = vmul.f32 %v2446_v0, %v2684_v36  ;;  %v2473_v36 = vmov 0.0|0.0  }
 0xe12   :  { %v1183_v12 = vadd.f32 0.5, %v1181_v29  ;;  %2302 = vmatprep.subr.bf16.mxu0 %v2473_v36  ;;  %2308 = vmatprep.subr.bf16.mxu1 %v2473_v36 }
 0xe13   :  { %v1184_v49 = vadd.f32 %v1182_v45, %v2689_v46  ;;  %v1245_v46 = vld [vmem:[%s3091_s5] sm:$0xff]  ;;  %2310 = vmatpush3.bf16.msra.mxu1 %v2979_v51 }
 0xe14   :  { %v1185_v50 = vmul.f32 %v1183_v12, %v1096_v20  ;;  %v2916_v61 = vpack.c.bf16 %v1246_v57, %v1245_v46  ;;  %v2944_v20 = vrot.slane %v1204_v19, %v2636_v35  ;;  %2311 = vmatprep.subr.bf16.mxu1 %v2473_v36 }
 0xe15   :  { %v1186_v15 = vmul.f32 %v1184_v49, %v1183_v12 }
 0xe16   :  { %2304 = vmatpush3.bf16.msra.mxu0 %v2916_v61 }
 0xe17   :  { %1188 = vrot.lane.b32.xlu1 %v1186_v15, %s2471_s1  ;;  %2305 = vmatprep.subr.bf16.mxu0 %v2473_v36 }
 0xe18   :  { %2313 = vmatpush3.bf16.msra.mxu1 %v2985_v47 }
 0xe19   :  { %2320 = vmatprep.subr.bf16.mxu1 %v2473_v36 }
 0xe1a   :  { %2307 = vmatpush3.bf16.msra.mxu0 %v2925_v63 }
 0xe1b   :  { %2314 = vmatprep.subr.bf16.mxu0 %v2473_v36 }
 0xe89   :  { %v1189_v52 = vpop.permute.xlu1 %1188 }
 0xe8a   :  { %v1191_v53 = vadd.f32 %v1189_v52, %v1185_v50 }
 0xe8c   :  { %2447 = vtanh.f32 %v1191_v53 }
 0xe96   :  { %v2448_v54 = vpop.eup %2447 }
 0xe97   :  { %v1193_v56 = vmul.f32 %v2448_v54, %v1184_v49 }
 0xe99   :  { %1195 = vrot.lane.b32.xlu1 %v1193_v56, %s2472_s0 }
 0xe9d   :  { %1235 = vperm.xlu1 %2393, %v2878_v1  }
 0xea1   :  { %1200 = vrot.lane.b32.xlu1 %v1191_v53, %s2472_s0 }
 0xea2   :  { %2395 = vset.pattern.permute.xlu1 %v2466_v4 }
 0xf0b   :  { %v1196_v2 = vpop.permute.xlu1 %1195 }
 0xf0c   :  { %v1198_v7 = vadd.f32 %v1196_v2, %v1193_v56 }
 0xf0e   :  { %1250 = vrot.lane.b32.xlu0 %v1198_v7, %s2471_s1 }
 0xf12   :  { %1240 = vperm.xlu0 %2394, %v2878_v1  }
 0xf16   :  { %2396 = vset.pattern.permute.xlu0 %v2468_v27 }
 0xf1c   :  { %v1236_v8 = vpop.permute.xlu1 %1235 }
 0xf1d   :  { %v1238_v25 = vmul.f32 %v1236_v8, %v2947_v22 }
 0xf20   :  { %v1201_v58 = vpop.permute.xlu1 %1200 }
 0xf21   :  { %v1203_v13 = vadd.f32 %v1201_v58, %v1191_v53 }
 0xf23   :  { %1332 = vrot.lane.b32.xlu1 %v1203_v13, %s2472_s0  ;;  %s2477_s0 = smov 4  }
 0xf80   :  { %v1251_v18 = vpop.permute.xlu0 %1250 }
 0xf81   :  { %2095 = vmatmul.mubr.msk.f32.vlgmr.msra.gmra.mrb[8].mxu0 %vm1252_vm3, %v1251_v18 }
 0xf82   :  { %2316 = vmatpush3.bf16.msra.mxu0 %v2916_v61  ;;  %2116 = vmatprep.mubr.msk.f32.mxu0 %vm2474_vm2, %v2465_v3 }
 0xf83   :  { %2317 = vmatprep.subr.bf16.mxu0 %v2473_v36 }
 0xf86   :  { %2319 = vmatpush3.bf16.msra.mxu0 %v2925_v63 }
 0xf87   :  { %2326 = vmatprep.subr.bf16.mxu0 %v2473_v36 }
 0xf91   :  { %v1241_v1 = vpop.permute.xlu0 %1240 }
 0xf92   :  { %v1243_v26 = vmul.f32 %v1241_v1, %v2944_v20 }
 0xf94   :  { %v1244_v14 = vadd.f32 %v1243_v26, %v1238_v25 }
 0xf95   :  { %v1333_v10 = vpop.permute.xlu1 %1332 }
0x1054   :  { %v1321_v35 = vpop.f32.mrb[8].mxu0 }
0x1055   :  { %v1325_v30 = vadd.f32 %v1321_v35, %v1244_v14  ;;  %v2096_v28 = vpop.f32.mrb[9].mxu0 }
0x1057   :  { %v1326_v33 = vadd.f32 %v2956_v31, %v1325_v30 }
0x1059   :  { %v1327_v37 = vmul.f32 %v1326_v33, %v2959_v32 }
0x105b   :  { %2449 = vtanh.f32 %v1327_v37 }
0x1065   :  { %v2450_v6 = vpop.eup %2449 }
0x1066   :  { %v1329_v38 = vmul.f32 %v2450_v6, %v2959_v32 }
0x1068   :  { %v1330_v9 = vadd.f32 %v1329_v38, %v2964_v21 }
0x106a   :  { %1337 = vrot.lane.b32.xlu0 %v1330_v9, %s2471_s1  ;;  %v1335_v42 = vmul.f32 %v1333_v10, %v1330_v9 }
0x10dc   :  { %v1338_v39 = vpop.permute.xlu0 %1337 }
0x10dd   :  { %v1340_v40 = vmul.f32 %v1338_v39, %v1330_v9 }
0x10df   :  { %1342 = vrot.lane.b32.xlu0 %v1340_v40, %s2475_s4 }
0x1151   :  { %v1343_v11 = vpop.permute.xlu0 %1342 }
0x1152   :  { %v1345_v16 = vadd.f32 %v1343_v11, %v1335_v42 }
0x1154   :  { %2451 = vtanh.f32 %v1345_v16 }
0x115e   :  { %v2452_v5 = vpop.eup %2451 }
0x115f   :  { %1348 = vrot.lane.b32.xlu1 %v2452_v5, %s2471_s1 }
0x11d1   :  { %v1349_v55 = vpop.permute.xlu1 %1348 }
0x11d2   :  { %v1351_v23 = vmul.f32 %v1349_v55, %v1330_v9 }
0x11d4   :  { %1357 = vrot.lane.b32.xlu0 %v1351_v23, %s2475_s4 }
0x1246   :  { %v1358_v48 = vpop.permute.xlu0 %1357 }
0x1247   :  { %2106 = vmatmul.mubr.msk.f32.vlgmr.msra.gmra.mrb[8].mxu1 %vm1252_vm3, %v1358_v48  ;;  %2117 = vmatmul.mubr.msk.f32.vlgmr.msra.gmra.mrb[10].mxu0 %vm1252_vm3, %v1358_v48 }
0x1248   :  { %2322 = vmatpush3.bf16.msra.mxu1 %v2979_v51  ;;  %2328 = vmatpush3.bf16.msra.mxu0 %v2916_v61 }
0x1249   :  { %2323 = vmatprep.subr.bf16.mxu1 %v2473_v36  ;;  %2329 = vmatprep.subr.bf16.mxu0 %v2473_v36 }
0x124a   :  { %2127 = vmatprep.mubr.msk.f32.mxu1 %vm2474_vm2, %v2465_v3  ;;  %2138 = vmatprep.mubr.msk.f32.mxu0 %vm2474_vm2, %v2465_v3 }
0x124c   :  { %2325 = vmatpush3.bf16.msra.mxu1 %v2985_v47  ;;  %2331 = vmatpush3.bf16.msra.mxu0 %v2925_v63 }
0x124d   :  { %2332 = vmatprep.subr.bf16.mxu1 %v2473_v36  ;;  %2338 = vmatprep.subr.bf16.mxu0 %v2473_v36 }
0x131a   :  { %v1427_v43 = vpop.f32.mrb[8].mxu1  ;;  %v1517_v60 = vpop.f32.mrb[10].mxu0 }
0x131b   :  { %v1428_v0 = vadd.f32 %v3009_v24, %v1427_v43  ;;  %v2107_v29 = vpop.f32.mrb[9].mxu1  ;;  %v2118_v45 = vpop.f32.mrb[11].mxu0 }
0x131d   :  { %v2036_v12 = vclamps-f32 %v1428_v0, 1.0 }
0x131f   :  { %1434 = vst.msk [vmem:[%s3096_s9] sm:$0xff] %vm1433_vm7, %v2036_v12  ;;  %1442 = vperm.xlu0 %2396, %v2036_v12   ;;  %1437 = vperm.xlu1 %2395, %v2036_v12  }
0x1323   :  { %2397 = vset.pattern.permute.xlu0 %v2466_v4  ;;  %2398 = vset.pattern.permute.xlu1 %v2468_v27 }
0x139e   :  { %v1443_v49 = vpop.permute.xlu0 %1442  ;;  %v1438_v15 = vpop.permute.xlu1 %1437 }
0x139f   :  { %v1445_v50 = vmul.f32 %v1443_v49, %v2944_v20  ;;  %v1440_v52 = vmul.f32 %v1438_v15, %v2947_v22 }
0x13a1   :  { %v1446_v53 = vadd.f32 %v1445_v50, %v1440_v52 }
0x13a3   :  { %v1521_v54 = vadd.f32 %v1517_v60, %v1446_v53 }
0x13a5   :  { %v1522_v56 = vadd.f32 %v2956_v31, %v1521_v54 }
0x13a7   :  { %v1523_v46 = vmul.f32 %v1522_v56, %v2959_v32 }
0x13a9   :  { %2453 = vtanh.f32 %v1523_v46 }
0x13b3   :  { %v2454_v57 = vpop.eup %2453 }
0x13b4   :  { %v1525_v59 = vmul.f32 %v2454_v57, %v2959_v32 }
0x13b6   :  { %v1526_v62 = vadd.f32 %v1525_v59, %v2964_v21 }
0x13b8   :  { %1529 = vrot.lane.b32.xlu1 %v1526_v62, %s2471_s1  ;;  %v1527_v8 = vmul.f32 %v1526_v62, %v1345_v16 }
0x142a   :  { %v1530_v2 = vpop.permute.xlu1 %1529 }
0x142b   :  { %v1532_v7 = vmul.f32 %v1530_v2, %v1526_v62 }
0x142d   :  { %1534 = vrot.lane.b32.xlu1 %v1532_v7, %s2475_s4 }
0x149f   :  { %v1535_v58 = vpop.permute.xlu1 %1534 }
0x14a0   :  { %v1537_v13 = vadd.f32 %v1535_v58, %v1527_v8 }
0x14a2   :  { %2455 = vtanh.f32 %v1537_v13 }
0x14ac   :  { %v2456_v18 = vpop.eup %2455 }
0x14ad   :  { %1540 = vrot.lane.b32.xlu0 %v2456_v18, %s2471_s1 }
0x151f   :  { %v1541_v19 = vpop.permute.xlu0 %1540 }
0x1520   :  { %v1543_v1 = vmul.f32 %v1541_v19, %v1526_v62 }
0x1522   :  { %1549 = vrot.lane.b32.xlu1 %v1543_v1, %s2475_s4 }
0x1594   :  { %v1550_v26 = vpop.permute.xlu1 %1549 }
0x1595   :  { %2128 = vmatmul.mubr.msk.f32.vlgmr.msra.gmra.mrb[10].mxu1 %vm1252_vm3, %v1550_v26  ;;  %2139 = vmatmul.mubr.msk.f32.vlgmr.msra.gmra.mrb[12].mxu0 %vm1252_vm3, %v1550_v26 }
0x1596   :  { %2334 = vmatpush3.bf16.msra.mxu1 %v2979_v51  ;;  %2340 = vmatpush3.bf16.msra.mxu0 %v2916_v61 }
0x1597   :  { %2335 = vmatprep.subr.bf16.mxu1 %v2473_v36  ;;  %2341 = vmatprep.subr.bf16.mxu0 %v2473_v36 }
0x1598   :  { %2149 = vmatprep.mubr.msk.f32.mxu1 %vm2474_vm2, %v2465_v3  ;;  %2160 = vmatprep.mubr.msk.f32.mxu0 %vm2474_vm2, %v2465_v3 }
0x159a   :  { %2337 = vmatpush3.bf16.msra.mxu1 %v2985_v47  ;;  %2343 = vmatpush3.bf16.msra.mxu0 %v2925_v63 }
0x159b   :  { %2344 = vmatprep.subr.bf16.mxu1 %v2473_v36 }
0x1668   :  { %v1619_v25 = vpop.f32.mrb[10].mxu1  ;;  %v1712_v14 = vpop.f32.mrb[12].mxu0 }
0x1669   :  { %v1620_v61 = vadd.f32 %v3009_v24, %v1619_v25  ;;  %v2129_v35 = vpop.f32.mrb[11].mxu1  ;;  %v2140_v30 = vpop.f32.mrb[13].mxu0 }
0x166b   :  { %v3041_v28 = vclamps-f32 %v1620_v61, 1.0 }
0x166d   :  { %1637 = vperm.xlu1 %2398, %v3041_v28   ;;  %1632 = vperm.xlu0 %2397, %v3041_v28  }
0x1671   :  { %2399 = vset.pattern.permute.xlu1 %v2466_v4  ;;  %2400 = vset.pattern.permute.xlu0 %v2468_v27 }
0x16ec   :  { %v1638_v33 = vpop.permute.xlu1 %1637  ;;  %v1633_v63 = vpop.permute.xlu0 %1632 }
0x16ed   :  { %v1640_v37 = vmul.f32 %v1638_v33, %v2944_v20  ;;  %v1635_v6 = vmul.f32 %v1633_v63, %v2947_v22 }
0x16ef   :  { %v1641_v38 = vadd.f32 %v1640_v37, %v1635_v6 }
0x16f1   :  { %v1716_v9 = vadd.f32 %v1712_v14, %v1641_v38 }
0x16f3   :  { %v1717_v39 = vadd.f32 %v2956_v31, %v1716_v9 }
0x16f5   :  { %v1718_v40 = vmul.f32 %v1717_v39, %v2959_v32 }
0x16f7   :  { %2457 = vtanh.f32 %v1718_v40 }
0x1701   :  { %v2458_v10 = vpop.eup %2457 }
0x1702   :  { %v1720_v42 = vmul.f32 %v2458_v10, %v2959_v32 }
0x1704   :  { %v1721_v4 = vadd.f32 %v1720_v42, %v2964_v21 }
0x1706   :  { %1724 = vrot.lane.b32.xlu1 %v1721_v4, %s2471_s1  ;;  %v1722_v16 = vmul.f32 %v1721_v4, %v1537_v13 }
0x1778   :  { %v1725_v27 = vpop.permute.xlu1 %1724 }
0x1779   :  { %v1727_v11 = vmul.f32 %v1725_v27, %v1721_v4 }
0x177b   :  { %1729 = vrot.lane.b32.xlu0 %v1727_v11, %s2475_s4 }
0x17ed   :  { %v1730_v34 = vpop.permute.xlu0 %1729 }
0x17ee   :  { %v1732_v41 = vadd.f32 %v1730_v34, %v1722_v16 }
0x17f0   :  { %2459 = vtanh.f32 %v1732_v41 }
0x17fa   :  { %v2460_v44 = vpop.eup %2459 }
0x17fb   :  { %1735 = vrot.lane.b32.xlu1 %v2460_v44, %s2471_s1 }
0x186d   :  { %v1736_v17 = vpop.permute.xlu1 %1735 }
0x186e   :  { %v1738_v5 = vmul.f32 %v1736_v17, %v1721_v4 }
0x1870   :  { %1744 = vrot.lane.b32.xlu0 %v1738_v5, %s2475_s4 }
0x18e2   :  { %v1745_v55 = vpop.permute.xlu0 %1744 }
0x18e3   :  { %2150 = vmatmul.mubr.msk.f32.vlgmr.msra.gmra.mrb[12].mxu1 %vm1252_vm3, %v1745_v55  ;;  %2161 = vmatmul.mubr.msk.f32.vlgmr.msra.gmra.mrb[14].mxu0 %vm1252_vm3, %v1745_v55 }
0x18e4   :  { %2346 = vmatpush3.bf16.msra.mxu1 %v2979_v51  ;;  %2171 = vmatprep.mubr.msk.f32.mxu1 %vm2474_vm2, %v2465_v3 }
0x18e5   :  { %2347 = vmatprep.subr.bf16.mxu1 %v2473_v36 }
0x18e8   :  { %2349 = vmatpush3.bf16.msra.mxu1 %v2985_v47 }
0x19b6   :  { %v1814_v23 = vpop.f32.mrb[12].mxu1  ;;  %v1907_v48 = vpop.f32.mrb[14].mxu0 }
0x19b7   :  { %v1815_v43 = vadd.f32 %v3009_v24, %v1814_v23  ;;  %v2151_v60 = vpop.f32.mrb[13].mxu1  ;;  %v2162_v0 = vpop.f32.mrb[15].mxu0 }
0x19b9   :  { %v2042_v29 = vclamps-f32 %v1815_v43, 1.0 }
0x19bb   :  { %1832 = vperm.xlu0 %2400, %v2042_v29   ;;  %1827 = vperm.xlu1 %2399, %v2042_v29  }
0x1a3a   :  { %v1833_v45 = vpop.permute.xlu0 %1832  ;;  %v1828_v12 = vpop.permute.xlu1 %1827 }
0x1a3b   :  { %v1835_v51 = vmul.f32 %v1833_v45, %v2944_v20  ;;  %v1830_v49 = vmul.f32 %v1828_v12, %v2947_v22 }
0x1a3d   :  { %v1836_v3 = vadd.f32 %v1835_v51, %v1830_v49 }
0x1a3f   :  { %v1911_v15 = vadd.f32 %v1907_v48, %v1836_v3 }
0x1a41   :  { %v1912_v36 = vadd.f32 %v2956_v31, %v1911_v15 }
0x1a43   :  { %v1913_v47 = vmul.f32 %v1912_v36, %v2959_v32 }
0x1a45   :  { %2461 = vtanh.f32 %v1913_v47 }
0x1a4f   :  { %v2462_v50 = vpop.eup %2461 }
0x1a50   :  { %v1915_v52 = vmul.f32 %v2462_v50, %v2959_v32 }
0x1a52   :  { %v1916_v53 = vadd.f32 %v1915_v52, %v2964_v21 }
0x1a54   :  { %1919 = vrot.lane.b32.xlu1 %v1916_v53, %s2471_s1  ;;  %v1917_v20 = vmul.f32 %v1916_v53, %v1732_v41 }
0x1ac6   :  { %v1920_v54 = vpop.permute.xlu1 %1919 }
0x1ac7   :  { %v1922_v56 = vmul.f32 %v1920_v54, %v1916_v53 }
0x1ac9   :  { %1924 = vrot.lane.b32.xlu1 %v1922_v56, %s2475_s4 }
0x1b3b   :  { %v1925_v22 = vpop.permute.xlu1 %1924 }
0x1b3c   :  { %v1927_v46 = vadd.f32 %v1925_v22, %v1917_v20 }
0x1b3e   :  { %2463 = vtanh.f32 %v1927_v46 }
0x1b48   :  { %v2464_v57 = vpop.eup %2463 }
0x1b49   :  { %1930 = vrot.lane.b32.xlu0 %v2464_v57, %s2471_s1 }
0x1b4d   :  { %1626 = vrot.lane.b32.xlu0 %v3041_v28, %s2476_s8 }
0x1bbb   :  { %v1931_v31 = vpop.permute.xlu0 %1930 }
0x1bbc   :  { %v1933_v32 = vmul.f32 %v1931_v31, %v1916_v53 }
0x1bbe   :  { %1939 = vrot.lane.b32.xlu1 %v1933_v32, %s2475_s4 }
0x1bbf   :  { %v1627_v21 = vpop.permute.xlu0 %1626 }
0x1bc0   :  { %1630 = vst.msk [vmem:[%s3096_s9] sm:$0xff] %vm1629_vm8, %v1627_v21 }
0x1bc2   :  { %1821 = vrot.lane.b32.xlu1 %v2042_v29, %s2477_s0 }
0x1c30   :  { %v1940_v59 = vpop.permute.xlu1 %1939 }
0x1c31   :  { %2172 = vmatmul.mubr.msk.f32.vlgmr.msra.gmra.mrb[14].mxu1 %vm1252_vm3, %v1940_v59 }
0x1c34   :  { %v1822_v62 = vpop.permute.xlu1 %1821 }
0x1c35   :  { %1825 = vst.msk [vmem:[%s3096_s9] sm:$0xff] %vm1824_vm9, %v1822_v62 }
0x1d04   :  { %v2009_v2 = vpop.f32.mrb[14].mxu1 }
0x1d05   :  { %v2010_v7 = vadd.f32 %v3009_v24, %v2009_v2  ;;  %v2173_v8 = vpop.f32.mrb[15].mxu1 }
0x1d07   :  { %v2045_v58 = vclamps-f32 %v2010_v7, 1.0 }
0x1d09   :  { %2016 = vrot.lane.b32.xlu0 %v2045_v58, %s2478_s18 }
0x1d7b   :  { %v2017_v13 = vpop.permute.xlu0 %2016 }
0x1d7c   :  { %2020 = vst.msk [vmem:[%s3096_s9] sm:$0xff] %vm2019_vm10, %v2017_v13 }

</bundles_post_ra>
